<compile_context>
chip_gen: v6e
topology: v6e:2x2x1
jax: 0.10.0
libtpu: 0.0.40
codegen_flags: <defaults>
</compile_context>

<pallas_src>
import jax
import jax.numpy as jnp
from jax import lax
from jax.experimental import pallas as pl
from jax.experimental.pallas import tpu as pltpu

INPUT_SIZE = 512
LATENT_DIM = 32
LANE_PAD = 128          # latent / hidden-64 dims zero-padded to a full lane width
BN_EPS = 1e-5


# ----------------------------------------------------------------------------
# Kernel: one BN-complete batch group per grid step.
# ----------------------------------------------------------------------------
def ae_kernel(x_ref,
              w1, b1, g1, e1,
              w2, b2, g2, e2,
              w3, b3, g3, e3,
              w4, b4,
              w5, b5, g5, e5,
              w6, b6, g6, e6,
              w7, b7, g7, e7,
              w8, b8,
              recon_ref, latent_ref):

    def lin(h, w_ref, b_ref):
        # bf16 operands into the MXU, f32 accumulate; bias add stays f32.
        return jnp.dot(h.astype(jnp.bfloat16), w_ref[...],
                       preferred_element_type=jnp.float32) + b_ref[...]

    def relu(h):
        return jnp.maximum(h, 0.0)

    def bn(h, g_ref, e_ref):
        # Training-mode BatchNorm1d (biased batch stats).  Both sublane
        # reductions issue back-to-back on the XLU; variance is clamped at 0
        # (E[x^2]-m^2 cancellation can go slightly negative); the affine is
        # folded to a single scale/shift so the BxN tile sees only 2 VPU ops.
        m = jnp.mean(h, axis=0, keepdims=True)
        ms = jnp.mean(h * h, axis=0, keepdims=True)
        v = jnp.maximum(ms - m * m, 0.0)
        scale = g_ref[...] * lax.rsqrt(v + BN_EPS)
        shift = e_ref[...] - m * scale
        return h * scale + shift

    h = x_ref[...]                                   # bf16 input block

    # --- encoder -----------------------------------------------------------
    h = bn(relu(lin(h, w1, b1)), g1, e1)             # 512 -> 256
    h = bn(relu(lin(h, w2, b2)), g2, e2)             # 256 -> 128
    h = bn(relu(lin(h, w3, b3)), g3, e3)             # 128 -> 128 (cols 64.. are 0)
    z = lin(h, w4, b4)                               # 128 -> 128 (cols 32.. are 0)
    latent_ref[...] = z                              # lane-dense (unmasked) store

    # --- decoder -----------------------------------------------------------
    h = bn(relu(lin(z, w5, b5)), g5, e5)             # 128 -> 128 (cols 64.. are 0)
    h = bn(relu(lin(h, w6, b6)), g6, e6)             # 128 -> 128
    h = bn(relu(lin(h, w7, b7)), g7, e7)             # 128 -> 256
    # TODO(synk): on v6e/v7x with very large batch groups, tanh in bf16 would
    # halve EUP time; kept f32 for accuracy parity with the PyTorch module.
    recon_ref[...] = jnp.tanh(lin(h, w8, b8))        # 256 -> 512, tanh


# ----------------------------------------------------------------------------
# Parameter preparation: bf16 weights + exact zero-padding of narrow dims.
# ----------------------------------------------------------------------------
def prepare_params(params):
    (w1, b1, g1, e1,
     w2, b2, g2, e2,
     w3, b3, g3, e3,
     w4, b4,
     w5, b5, g5, e5,
     w6, b6, g6, e6,
     w7, b7, g7, e7,
     w8, b8) = params

    def pc(a, n, v=0.0):   # pad columns (last dim) to n
        return jnp.pad(a, ((0, 0), (0, n - a.shape[1])), constant_values=v)

    def pr(a, n):          # pad rows (first dim) to n with zeros
        return jnp.pad(a, ((0, n - a.shape[0]), (0, 0)))

    bf = lambda w: w.astype(jnp.bfloat16)
    P = LANE_PAD

    # Padded weight cols / rows and padded biases & betas are zero, so padded
    # activation lanes stay identically zero through Linear -> ReLU -> BN.
    # Gamma is padded with 1.0 only to keep the scale finite; it multiplies 0.
    return [
        bf(w1), b1, g1, e1,
        bf(w2), b2, g2, e2,
        bf(pc(w3, P)), pc(b3, P), pc(g3, P, 1.0), pc(e3, P),
        bf(pr(pc(w4, P), P)), pc(b4, P),
        bf(pr(pc(w5, P), P)), pc(b5, P), pc(g5, P, 1.0), pc(e5, P),
        bf(pr(w6, P)), b6, g6, e6,
        bf(w7), b7, g7, e7,
        bf(w8), b8,
    ]


# ----------------------------------------------------------------------------
# Wrapper
# ----------------------------------------------------------------------------
def ecg_autoencoder_forward(x, params, *, num_groups=1):
    """x: [B, INPUT_SIZE] f32 -> (reconstructed [B, INPUT_SIZE], latent [B, LATENT_DIM]).

    num_groups=1 (default): BatchNorm stats over the whole batch (exact PyTorch
    training-mode semantics).  num_groups>1: each group of B//num_groups rows
    is an independent BN batch processed on its own ("parallel") grid step.
    """
    B = x.shape[0]
    assert x.shape[1] == INPUT_SIZE
    assert B % num_groups == 0
    Bg = B // num_groups
    if num_groups > 1:
        assert Bg % 8 == 0, "per-group batch must be a multiple of 8 for (8,128) tiling"

    prepped = prepare_params(params)
    x_bf = x.astype(jnp.bfloat16)        # halve input HBM traffic

    batched = lambda g: (g, 0)           # x / recon / latent: one group per step
    const = lambda g: (0, 0)             # params: same block every step -> VMEM-resident

    in_specs = [pl.BlockSpec((Bg, INPUT_SIZE), batched)]
    in_specs += [pl.BlockSpec(p.shape, const) for p in prepped]

    out_shape = (
        jax.ShapeDtypeStruct((B, INPUT_SIZE), jnp.float32),
        jax.ShapeDtypeStruct((B, LANE_PAD), jnp.float32),
    )
    out_specs = (pl.BlockSpec((Bg, INPUT_SIZE), batched),
                 pl.BlockSpec((Bg, LANE_PAD), batched))

    flops = 2 * B * (512 * 256 + 256 * 128 + 128 * 128 + 128 * 128
                     + 128 * 128 + 128 * 128 + 128 * 256 + 256 * 512)
    param_bytes = sum(int(p.size) * p.dtype.itemsize for p in prepped)
    bytes_accessed = (int(x_bf.size) * 2
                      + B * INPUT_SIZE * 4 + B * LANE_PAD * 4
                      + param_bytes)
    cost = pl.CostEstimate(flops=flops, transcendentals=B * INPUT_SIZE,
                           bytes_accessed=bytes_accessed)

    recon, latent_pad = pl.pallas_call(
        ae_kernel,
        out_shape=out_shape,
        grid=(num_groups,),
        in_specs=in_specs,
        out_specs=out_specs,
        compiler_params=pltpu.CompilerParams(
            dimension_semantics=("parallel",)),
        cost_estimate=cost,
    )(x_bf, *prepped)
    return recon, latent_pad[:, :LATENT_DIM]


# ----------------------------------------------------------------------------
# Deterministic parameter init (PyTorch Linear defaults: U(+-1/sqrt(fan_in));
# BN gamma=1, beta=0).  Weights stored f32 [in, out]; wrapper casts to bf16.
# ----------------------------------------------------------------------------
def init_params(key):
    dims = [(INPUT_SIZE, 256), (256, 128), (128, 64), (64, LATENT_DIM),
            (LATENT_DIM, 64), (64, 128), (128, 256), (256, INPUT_SIZE)]
    has_bn = [True, True, True, False, True, True, True, False]
    params = []
    keys = jax.random.split(key, len(dims))
    for k, (fi, fo), bn_flag in zip(keys, dims, has_bn):
        kw, kb = jax.random.split(k)
        bound = 1.0 / (fi ** 0.5)
        w = jax.random.uniform(kw, (fi, fo), jnp.float32, -bound, bound)
        b = jax.random.uniform(kb, (1, fo), jnp.float32, -bound, bound)
        params.extend([w, b])
        if bn_flag:
            params.extend([jnp.ones((1, fo), jnp.float32),
                           jnp.zeros((1, fo), jnp.float32)])
    return params


# ----------------------------------------------------------------------------
# Pure-JAX reference (same bf16-matmul convention, unpadded params).
# ----------------------------------------------------------------------------
def reference_forward(x, params):
    def lin(h, w, b):
        return jnp.dot(h.astype(jnp.bfloat16), w.astype(jnp.bfloat16),
                       preferred_element_type=jnp.float32) + b

    def bn(h, g, e):
        m = jnp.mean(h, axis=0, keepdims=True)
        v = jnp.maximum(jnp.mean(h * h, axis=0, keepdims=True) - m * m, 0.0)
        return (h - m) * lax.rsqrt(v + BN_EPS) * g + e

    p = list(params)
    h = x
    h = bn(jnp.maximum(lin(h, p[0], p[1]), 0.0), p[2], p[3])
    h = bn(jnp.maximum(lin(h, p[4], p[5]), 0.0), p[6], p[7])
    h = bn(jnp.maximum(lin(h, p[8], p[9]), 0.0), p[10], p[11])
    z = lin(h, p[12], p[13])
    h = bn(jnp.maximum(lin(z, p[14], p[15]), 0.0), p[16], p[17])
    h = bn(jnp.maximum(lin(h, p[18], p[19]), 0.0), p[20], p[21])
    h = bn(jnp.maximum(lin(h, p[22], p[23]), 0.0), p[24], p[25])
    r = jnp.tanh(lin(h, p[26], p[27]))
    return r, z


if __name__ == "__main__":
    key = jax.random.PRNGKey(0)
    k_x, k_p = jax.random.split(key)

    B = 16
    x = jax.random.normal(k_x, (B, INPUT_SIZE), jnp.float32)
    params = init_params(k_p)

    # --- 1) single group: exact whole-batch BatchNorm semantics -------------
    recon, latent = ecg_autoencoder_forward(x, params, num_groups=1)
    jax.block_until_ready((recon, latent))
    r_ref, z_ref = reference_forward(x, params)
    assert recon.shape == (B, INPUT_SIZE) and latent.shape == (B, LATENT_DIM)
    assert jnp.allclose(recon, r_ref, atol=5e-2, rtol=5e-2)
    assert jnp.allclose(latent, z_ref, atol=5e-2, rtol=5e-2)

    # --- 2) two groups: grid pipelining / megacore path (per-group BN) ------
    num_groups, Bg = 2, B // 2
    recon_g, latent_g = ecg_autoencoder_forward(x, params, num_groups=num_groups)
    jax.block_until_ready((recon_g, latent_g))
    r_parts, z_parts = [], []
    for g in range(num_groups):
        rg, zg = reference_forward(x[g * Bg:(g + 1) * Bg], params)
        r_parts.append(rg)
        z_parts.append(zg)
    assert jnp.allclose(recon_g, jnp.concatenate(r_parts), atol=5e-2, rtol=5e-2)
    assert jnp.allclose(latent_g, jnp.concatenate(z_parts), atol=5e-2, rtol=5e-2)

    print("KERNEL_OK")
</pallas_src>

<mosaic_0001>
module attributes {stable_mosaic.version = 11 : i64} {
  func.func @ae_kernel(%arg0: i32, %arg1: memref<16x512xbf16, #tpu.memory_space<vmem>>, %arg2: memref<512x256xbf16, #tpu.memory_space<vmem>>, %arg3: memref<1x256xf32, #tpu.memory_space<vmem>>, %arg4: memref<1x256xf32, #tpu.memory_space<vmem>>, %arg5: memref<1x256xf32, #tpu.memory_space<vmem>>, %arg6: memref<256x128xbf16, #tpu.memory_space<vmem>>, %arg7: memref<1x128xf32, #tpu.memory_space<vmem>>, %arg8: memref<1x128xf32, #tpu.memory_space<vmem>>, %arg9: memref<1x128xf32, #tpu.memory_space<vmem>>, %arg10: memref<128x128xbf16, #tpu.memory_space<vmem>>, %arg11: memref<1x128xf32, #tpu.memory_space<vmem>>, %arg12: memref<1x128xf32, #tpu.memory_space<vmem>>, %arg13: memref<1x128xf32, #tpu.memory_space<vmem>>, %arg14: memref<128x128xbf16, #tpu.memory_space<vmem>>, %arg15: memref<1x128xf32, #tpu.memory_space<vmem>>, %arg16: memref<128x128xbf16, #tpu.memory_space<vmem>>, %arg17: memref<1x128xf32, #tpu.memory_space<vmem>>, %arg18: memref<1x128xf32, #tpu.memory_space<vmem>>, %arg19: memref<1x128xf32, #tpu.memory_space<vmem>>, %arg20: memref<128x128xbf16, #tpu.memory_space<vmem>>, %arg21: memref<1x128xf32, #tpu.memory_space<vmem>>, %arg22: memref<1x128xf32, #tpu.memory_space<vmem>>, %arg23: memref<1x128xf32, #tpu.memory_space<vmem>>, %arg24: memref<128x256xbf16, #tpu.memory_space<vmem>>, %arg25: memref<1x256xf32, #tpu.memory_space<vmem>>, %arg26: memref<1x256xf32, #tpu.memory_space<vmem>>, %arg27: memref<1x256xf32, #tpu.memory_space<vmem>>, %arg28: memref<256x512xbf16, #tpu.memory_space<vmem>>, %arg29: memref<1x512xf32, #tpu.memory_space<vmem>>, %arg30: memref<16x512xf32, #tpu.memory_space<vmem>>, %arg31: memref<16x128xf32, #tpu.memory_space<vmem>>) attributes {dimension_semantics = [#tpu.dimension_semantics<parallel>], iteration_bounds = array<i64: 1>, scalar_prefetch = 0 : i64, scratch_operands = 0 : i64, tpu.core_type = #tpu.core_type<tc>, window_params = [{transform_indices = @transform_0, window_bounds = array<i64: 16, 512>}, {pipeline_mode = #tpu.pipeline_mode<synchronous>, transform_indices = @transform_1, window_bounds = array<i64: 512, 256>}, {pipeline_mode = #tpu.pipeline_mode<synchronous>, transform_indices = @transform_2, window_bounds = array<i64: 1, 256>}, {pipeline_mode = #tpu.pipeline_mode<synchronous>, transform_indices = @transform_3, window_bounds = array<i64: 1, 256>}, {pipeline_mode = #tpu.pipeline_mode<synchronous>, transform_indices = @transform_4, window_bounds = array<i64: 1, 256>}, {pipeline_mode = #tpu.pipeline_mode<synchronous>, transform_indices = @transform_5, window_bounds = array<i64: 256, 128>}, {pipeline_mode = #tpu.pipeline_mode<synchronous>, transform_indices = @transform_6, window_bounds = array<i64: 1, 128>}, {pipeline_mode = #tpu.pipeline_mode<synchronous>, transform_indices = @transform_7, window_bounds = array<i64: 1, 128>}, {pipeline_mode = #tpu.pipeline_mode<synchronous>, transform_indices = @transform_8, window_bounds = array<i64: 1, 128>}, {pipeline_mode = #tpu.pipeline_mode<synchronous>, transform_indices = @transform_9, window_bounds = array<i64: 128, 128>}, {pipeline_mode = #tpu.pipeline_mode<synchronous>, transform_indices = @transform_10, window_bounds = array<i64: 1, 128>}, {pipeline_mode = #tpu.pipeline_mode<synchronous>, transform_indices = @transform_11, window_bounds = array<i64: 1, 128>}, {pipeline_mode = #tpu.pipeline_mode<synchronous>, transform_indices = @transform_12, window_bounds = array<i64: 1, 128>}, {pipeline_mode = #tpu.pipeline_mode<synchronous>, transform_indices = @transform_13, window_bounds = array<i64: 128, 128>}, {pipeline_mode = #tpu.pipeline_mode<synchronous>, transform_indices = @transform_14, window_bounds = array<i64: 1, 128>}, {pipeline_mode = #tpu.pipeline_mode<synchronous>, transform_indices = @transform_15, window_bounds = array<i64: 128, 128>}, {pipeline_mode = #tpu.pipeline_mode<synchronous>, transform_indices = @transform_16, window_bounds = array<i64: 1, 128>}, {pipeline_mode = #tpu.pipeline_mode<synchronous>, transform_indices = @transform_17, window_bounds = array<i64: 1, 128>}, {pipeline_mode = #tpu.pipeline_mode<synchronous>, transform_indices = @transform_18, window_bounds = array<i64: 1, 128>}, {pipeline_mode = #tpu.pipeline_mode<synchronous>, transform_indices = @transform_19, window_bounds = array<i64: 128, 128>}, {pipeline_mode = #tpu.pipeline_mode<synchronous>, transform_indices = @transform_20, window_bounds = array<i64: 1, 128>}, {pipeline_mode = #tpu.pipeline_mode<synchronous>, transform_indices = @transform_21, window_bounds = array<i64: 1, 128>}, {pipeline_mode = #tpu.pipeline_mode<synchronous>, transform_indices = @transform_22, window_bounds = array<i64: 1, 128>}, {pipeline_mode = #tpu.pipeline_mode<synchronous>, transform_indices = @transform_23, window_bounds = array<i64: 128, 256>}, {pipeline_mode = #tpu.pipeline_mode<synchronous>, transform_indices = @transform_24, window_bounds = array<i64: 1, 256>}, {pipeline_mode = #tpu.pipeline_mode<synchronous>, transform_indices = @transform_25, window_bounds = array<i64: 1, 256>}, {pipeline_mode = #tpu.pipeline_mode<synchronous>, transform_indices = @transform_26, window_bounds = array<i64: 1, 256>}, {pipeline_mode = #tpu.pipeline_mode<synchronous>, transform_indices = @transform_27, window_bounds = array<i64: 256, 512>}, {pipeline_mode = #tpu.pipeline_mode<synchronous>, transform_indices = @transform_28, window_bounds = array<i64: 1, 512>}, {transform_indices = @transform_29, window_bounds = array<i64: 16, 512>}, {transform_indices = @transform_30, window_bounds = array<i64: 16, 128>}]} {
    %c0 = arith.constant 0 : index
    %c0_0 = arith.constant 0 : index
    %0 = vector.load %arg1[%c0, %c0_0] : memref<16x512xbf16, #tpu.memory_space<vmem>>, vector<16x512xbf16>
    %c0_1 = arith.constant 0 : index
    %c0_2 = arith.constant 0 : index
    %1 = vector.load %arg2[%c0_1, %c0_2] : memref<512x256xbf16, #tpu.memory_space<vmem>>, vector<512x256xbf16>
    %cst = arith.constant dense<0.000000e+00> : vector<16x256xf32>
    %2 = tpu.matmul %0, %1, %cst {dimension_numbers = #tpu.dot_dimension_numbers<[1], [0], [0], [1], [0, 0, 1, 1], [], []>} : vector<16x512xbf16>, vector<512x256xbf16>, vector<16x256xf32> -> vector<16x256xf32>
    %c0_3 = arith.constant 0 : index
    %c0_4 = arith.constant 0 : index
    %3 = vector.load %arg3[%c0_3, %c0_4] : memref<1x256xf32, #tpu.memory_space<vmem>>, vector<1x256xf32>
    %4 = vector.broadcast %3 : vector<1x256xf32> to vector<16x256xf32>
    %5 = arith.addf %2, %4 : vector<16x256xf32>
    %cst_5 = arith.constant 0.000000e+00 : f32
    %6 = vector.broadcast %cst_5 : f32 to vector<16x256xf32>
    %7 = arith.maximumf %5, %6 : vector<16x256xf32>
    %cst_6 = arith.constant dense<0.000000e+00> : vector<256xf32>
    %8 = vector.multi_reduction <add>, %7, %cst_6 [0] : vector<16x256xf32> to vector<256xf32>
    %9 = vector.shape_cast %8 : vector<256xf32> to vector<1x256xf32>
    %cst_7 = arith.constant 1.600000e+01 : f32
    %10 = vector.broadcast %cst_7 : f32 to vector<1x256xf32>
    %11 = arith.divf %9, %10 : vector<1x256xf32>
    %12 = arith.mulf %7, %7 : vector<16x256xf32>
    %cst_8 = arith.constant dense<0.000000e+00> : vector<256xf32>
    %13 = vector.multi_reduction <add>, %12, %cst_8 [0] : vector<16x256xf32> to vector<256xf32>
    %14 = vector.shape_cast %13 : vector<256xf32> to vector<1x256xf32>
    %cst_9 = arith.constant 1.600000e+01 : f32
    %15 = vector.broadcast %cst_9 : f32 to vector<1x256xf32>
    %16 = arith.divf %14, %15 : vector<1x256xf32>
    %17 = arith.mulf %11, %11 : vector<1x256xf32>
    %18 = arith.subf %16, %17 : vector<1x256xf32>
    %cst_10 = arith.constant 0.000000e+00 : f32
    %19 = vector.broadcast %cst_10 : f32 to vector<1x256xf32>
    %20 = arith.maximumf %18, %19 : vector<1x256xf32>
    %c0_11 = arith.constant 0 : index
    %c0_12 = arith.constant 0 : index
    %21 = vector.load %arg4[%c0_11, %c0_12] : memref<1x256xf32, #tpu.memory_space<vmem>>, vector<1x256xf32>
    %cst_13 = arith.constant 9.99999974E-6 : f32
    %22 = vector.broadcast %cst_13 : f32 to vector<1x256xf32>
    %23 = arith.addf %20, %22 : vector<1x256xf32>
    %24 = math.rsqrt %23 : vector<1x256xf32>
    %25 = arith.mulf %21, %24 : vector<1x256xf32>
    %c0_14 = arith.constant 0 : index
    %c0_15 = arith.constant 0 : index
    %26 = vector.load %arg5[%c0_14, %c0_15] : memref<1x256xf32, #tpu.memory_space<vmem>>, vector<1x256xf32>
    %27 = arith.mulf %11, %25 : vector<1x256xf32>
    %28 = arith.subf %26, %27 : vector<1x256xf32>
    %29 = vector.broadcast %25 : vector<1x256xf32> to vector<16x256xf32>
    %30 = arith.mulf %7, %29 : vector<16x256xf32>
    %31 = vector.broadcast %28 : vector<1x256xf32> to vector<16x256xf32>
    %32 = arith.addf %30, %31 : vector<16x256xf32>
    %33 = arith.truncf %32 : vector<16x256xf32> to vector<16x256xbf16>
    %c0_16 = arith.constant 0 : index
    %c0_17 = arith.constant 0 : index
    %34 = vector.load %arg6[%c0_16, %c0_17] : memref<256x128xbf16, #tpu.memory_space<vmem>>, vector<256x128xbf16>
    %cst_18 = arith.constant dense<0.000000e+00> : vector<16x128xf32>
    %35 = tpu.matmul %33, %34, %cst_18 {dimension_numbers = #tpu.dot_dimension_numbers<[1], [0], [0], [1], [0, 0, 1, 1], [], []>} : vector<16x256xbf16>, vector<256x128xbf16>, vector<16x128xf32> -> vector<16x128xf32>
    %c0_19 = arith.constant 0 : index
    %c0_20 = arith.constant 0 : index
    %36 = vector.load %arg7[%c0_19, %c0_20] : memref<1x128xf32, #tpu.memory_space<vmem>>, vector<1x128xf32>
    %37 = vector.broadcast %36 : vector<1x128xf32> to vector<16x128xf32>
    %38 = arith.addf %35, %37 : vector<16x128xf32>
    %cst_21 = arith.constant 0.000000e+00 : f32
    %39 = vector.broadcast %cst_21 : f32 to vector<16x128xf32>
    %40 = arith.maximumf %38, %39 : vector<16x128xf32>
    %cst_22 = arith.constant dense<0.000000e+00> : vector<128xf32>
    %41 = vector.multi_reduction <add>, %40, %cst_22 [0] : vector<16x128xf32> to vector<128xf32>
    %42 = vector.shape_cast %41 : vector<128xf32> to vector<1x128xf32>
    %cst_23 = arith.constant 1.600000e+01 : f32
    %43 = vector.broadcast %cst_23 : f32 to vector<1x128xf32>
    %44 = arith.divf %42, %43 : vector<1x128xf32>
    %45 = arith.mulf %40, %40 : vector<16x128xf32>
    %cst_24 = arith.constant dense<0.000000e+00> : vector<128xf32>
    %46 = vector.multi_reduction <add>, %45, %cst_24 [0] : vector<16x128xf32> to vector<128xf32>
    %47 = vector.shape_cast %46 : vector<128xf32> to vector<1x128xf32>
    %cst_25 = arith.constant 1.600000e+01 : f32
    %48 = vector.broadcast %cst_25 : f32 to vector<1x128xf32>
    %49 = arith.divf %47, %48 : vector<1x128xf32>
    %50 = arith.mulf %44, %44 : vector<1x128xf32>
    %51 = arith.subf %49, %50 : vector<1x128xf32>
    %cst_26 = arith.constant 0.000000e+00 : f32
    %52 = vector.broadcast %cst_26 : f32 to vector<1x128xf32>
    %53 = arith.maximumf %51, %52 : vector<1x128xf32>
    %c0_27 = arith.constant 0 : index
    %c0_28 = arith.constant 0 : index
    %54 = vector.load %arg8[%c0_27, %c0_28] : memref<1x128xf32, #tpu.memory_space<vmem>>, vector<1x128xf32>
    %cst_29 = arith.constant 9.99999974E-6 : f32
    %55 = vector.broadcast %cst_29 : f32 to vector<1x128xf32>
    %56 = arith.addf %53, %55 : vector<1x128xf32>
    %57 = math.rsqrt %56 : vector<1x128xf32>
    %58 = arith.mulf %54, %57 : vector<1x128xf32>
    %c0_30 = arith.constant 0 : index
    %c0_31 = arith.constant 0 : index
    %59 = vector.load %arg9[%c0_30, %c0_31] : memref<1x128xf32, #tpu.memory_space<vmem>>, vector<1x128xf32>
    %60 = arith.mulf %44, %58 : vector<1x128xf32>
    %61 = arith.subf %59, %60 : vector<1x128xf32>
    %62 = vector.broadcast %58 : vector<1x128xf32> to vector<16x128xf32>
    %63 = arith.mulf %40, %62 : vector<16x128xf32>
    %64 = vector.broadcast %61 : vector<1x128xf32> to vector<16x128xf32>
    %65 = arith.addf %63, %64 : vector<16x128xf32>
    %66 = arith.truncf %65 : vector<16x128xf32> to vector<16x128xbf16>
    %c0_32 = arith.constant 0 : index
    %c0_33 = arith.constant 0 : index
    %67 = vector.load %arg10[%c0_32, %c0_33] : memref<128x128xbf16, #tpu.memory_space<vmem>>, vector<128x128xbf16>
    %cst_34 = arith.constant dense<0.000000e+00> : vector<16x128xf32>
    %68 = tpu.matmul %66, %67, %cst_34 {dimension_numbers = #tpu.dot_dimension_numbers<[1], [0], [0], [1], [0, 0, 1, 1], [], []>} : vector<16x128xbf16>, vector<128x128xbf16>, vector<16x128xf32> -> vector<16x128xf32>
    %c0_35 = arith.constant 0 : index
    %c0_36 = arith.constant 0 : index
    %69 = vector.load %arg11[%c0_35, %c0_36] : memref<1x128xf32, #tpu.memory_space<vmem>>, vector<1x128xf32>
    %70 = vector.broadcast %69 : vector<1x128xf32> to vector<16x128xf32>
    %71 = arith.addf %68, %70 : vector<16x128xf32>
    %cst_37 = arith.constant 0.000000e+00 : f32
    %72 = vector.broadcast %cst_37 : f32 to vector<16x128xf32>
    %73 = arith.maximumf %71, %72 : vector<16x128xf32>
    %cst_38 = arith.constant dense<0.000000e+00> : vector<128xf32>
    %74 = vector.multi_reduction <add>, %73, %cst_38 [0] : vector<16x128xf32> to vector<128xf32>
    %75 = vector.shape_cast %74 : vector<128xf32> to vector<1x128xf32>
    %cst_39 = arith.constant 1.600000e+01 : f32
    %76 = vector.broadcast %cst_39 : f32 to vector<1x128xf32>
    %77 = arith.divf %75, %76 : vector<1x128xf32>
    %78 = arith.mulf %73, %73 : vector<16x128xf32>
    %cst_40 = arith.constant dense<0.000000e+00> : vector<128xf32>
    %79 = vector.multi_reduction <add>, %78, %cst_40 [0] : vector<16x128xf32> to vector<128xf32>
    %80 = vector.shape_cast %79 : vector<128xf32> to vector<1x128xf32>
    %cst_41 = arith.constant 1.600000e+01 : f32
    %81 = vector.broadcast %cst_41 : f32 to vector<1x128xf32>
    %82 = arith.divf %80, %81 : vector<1x128xf32>
    %83 = arith.mulf %77, %77 : vector<1x128xf32>
    %84 = arith.subf %82, %83 : vector<1x128xf32>
    %cst_42 = arith.constant 0.000000e+00 : f32
    %85 = vector.broadcast %cst_42 : f32 to vector<1x128xf32>
    %86 = arith.maximumf %84, %85 : vector<1x128xf32>
    %c0_43 = arith.constant 0 : index
    %c0_44 = arith.constant 0 : index
    %87 = vector.load %arg12[%c0_43, %c0_44] : memref<1x128xf32, #tpu.memory_space<vmem>>, vector<1x128xf32>
    %cst_45 = arith.constant 9.99999974E-6 : f32
    %88 = vector.broadcast %cst_45 : f32 to vector<1x128xf32>
    %89 = arith.addf %86, %88 : vector<1x128xf32>
    %90 = math.rsqrt %89 : vector<1x128xf32>
    %91 = arith.mulf %87, %90 : vector<1x128xf32>
    %c0_46 = arith.constant 0 : index
    %c0_47 = arith.constant 0 : index
    %92 = vector.load %arg13[%c0_46, %c0_47] : memref<1x128xf32, #tpu.memory_space<vmem>>, vector<1x128xf32>
    %93 = arith.mulf %77, %91 : vector<1x128xf32>
    %94 = arith.subf %92, %93 : vector<1x128xf32>
    %95 = vector.broadcast %91 : vector<1x128xf32> to vector<16x128xf32>
    %96 = arith.mulf %73, %95 : vector<16x128xf32>
    %97 = vector.broadcast %94 : vector<1x128xf32> to vector<16x128xf32>
    %98 = arith.addf %96, %97 : vector<16x128xf32>
    %99 = arith.truncf %98 : vector<16x128xf32> to vector<16x128xbf16>
    %c0_48 = arith.constant 0 : index
    %c0_49 = arith.constant 0 : index
    %100 = vector.load %arg14[%c0_48, %c0_49] : memref<128x128xbf16, #tpu.memory_space<vmem>>, vector<128x128xbf16>
    %cst_50 = arith.constant dense<0.000000e+00> : vector<16x128xf32>
    %101 = tpu.matmul %99, %100, %cst_50 {dimension_numbers = #tpu.dot_dimension_numbers<[1], [0], [0], [1], [0, 0, 1, 1], [], []>} : vector<16x128xbf16>, vector<128x128xbf16>, vector<16x128xf32> -> vector<16x128xf32>
    %c0_51 = arith.constant 0 : index
    %c0_52 = arith.constant 0 : index
    %102 = vector.load %arg15[%c0_51, %c0_52] : memref<1x128xf32, #tpu.memory_space<vmem>>, vector<1x128xf32>
    %103 = vector.broadcast %102 : vector<1x128xf32> to vector<16x128xf32>
    %104 = arith.addf %101, %103 : vector<16x128xf32>
    %c0_53 = arith.constant 0 : index
    %c0_54 = arith.constant 0 : index
    %105 = vector.load %arg31[%c0_53, %c0_54] : memref<16x128xf32, #tpu.memory_space<vmem>>, vector<16x128xf32>
    tpu.vector_store %arg31[%c0_53, %c0_54], %104 {strides = array<i32>} : memref<16x128xf32, #tpu.memory_space<vmem>>, vector<16x128xf32>,
    %106 = arith.truncf %104 : vector<16x128xf32> to vector<16x128xbf16>
    %c0_55 = arith.constant 0 : index
    %c0_56 = arith.constant 0 : index
    %107 = vector.load %arg16[%c0_55, %c0_56] : memref<128x128xbf16, #tpu.memory_space<vmem>>, vector<128x128xbf16>
    %cst_57 = arith.constant dense<0.000000e+00> : vector<16x128xf32>
    %108 = tpu.matmul %106, %107, %cst_57 {dimension_numbers = #tpu.dot_dimension_numbers<[1], [0], [0], [1], [0, 0, 1, 1], [], []>} : vector<16x128xbf16>, vector<128x128xbf16>, vector<16x128xf32> -> vector<16x128xf32>
    %c0_58 = arith.constant 0 : index
    %c0_59 = arith.constant 0 : index
    %109 = vector.load %arg17[%c0_58, %c0_59] : memref<1x128xf32, #tpu.memory_space<vmem>>, vector<1x128xf32>
    %110 = vector.broadcast %109 : vector<1x128xf32> to vector<16x128xf32>
    %111 = arith.addf %108, %110 : vector<16x128xf32>
    %cst_60 = arith.constant 0.000000e+00 : f32
    %112 = vector.broadcast %cst_60 : f32 to vector<16x128xf32>
    %113 = arith.maximumf %111, %112 : vector<16x128xf32>
    %cst_61 = arith.constant dense<0.000000e+00> : vector<128xf32>
    %114 = vector.multi_reduction <add>, %113, %cst_61 [0] : vector<16x128xf32> to vector<128xf32>
    %115 = vector.shape_cast %114 : vector<128xf32> to vector<1x128xf32>
    %cst_62 = arith.constant 1.600000e+01 : f32
    %116 = vector.broadcast %cst_62 : f32 to vector<1x128xf32>
    %117 = arith.divf %115, %116 : vector<1x128xf32>
    %118 = arith.mulf %113, %113 : vector<16x128xf32>
    %cst_63 = arith.constant dense<0.000000e+00> : vector<128xf32>
    %119 = vector.multi_reduction <add>, %118, %cst_63 [0] : vector<16x128xf32> to vector<128xf32>
    %120 = vector.shape_cast %119 : vector<128xf32> to vector<1x128xf32>
    %cst_64 = arith.constant 1.600000e+01 : f32
    %121 = vector.broadcast %cst_64 : f32 to vector<1x128xf32>
    %122 = arith.divf %120, %121 : vector<1x128xf32>
    %123 = arith.mulf %117, %117 : vector<1x128xf32>
    %124 = arith.subf %122, %123 : vector<1x128xf32>
    %cst_65 = arith.constant 0.000000e+00 : f32
    %125 = vector.broadcast %cst_65 : f32 to vector<1x128xf32>
    %126 = arith.maximumf %124, %125 : vector<1x128xf32>
    %c0_66 = arith.constant 0 : index
    %c0_67 = arith.constant 0 : index
    %127 = vector.load %arg18[%c0_66, %c0_67] : memref<1x128xf32, #tpu.memory_space<vmem>>, vector<1x128xf32>
    %cst_68 = arith.constant 9.99999974E-6 : f32
    %128 = vector.broadcast %cst_68 : f32 to vector<1x128xf32>
    %129 = arith.addf %126, %128 : vector<1x128xf32>
    %130 = math.rsqrt %129 : vector<1x128xf32>
    %131 = arith.mulf %127, %130 : vector<1x128xf32>
    %c0_69 = arith.constant 0 : index
    %c0_70 = arith.constant 0 : index
    %132 = vector.load %arg19[%c0_69, %c0_70] : memref<1x128xf32, #tpu.memory_space<vmem>>, vector<1x128xf32>
    %133 = arith.mulf %117, %131 : vector<1x128xf32>
    %134 = arith.subf %132, %133 : vector<1x128xf32>
    %135 = vector.broadcast %131 : vector<1x128xf32> to vector<16x128xf32>
    %136 = arith.mulf %113, %135 : vector<16x128xf32>
    %137 = vector.broadcast %134 : vector<1x128xf32> to vector<16x128xf32>
    %138 = arith.addf %136, %137 : vector<16x128xf32>
    %139 = arith.truncf %138 : vector<16x128xf32> to vector<16x128xbf16>
    %c0_71 = arith.constant 0 : index
    %c0_72 = arith.constant 0 : index
    %140 = vector.load %arg20[%c0_71, %c0_72] : memref<128x128xbf16, #tpu.memory_space<vmem>>, vector<128x128xbf16>
    %cst_73 = arith.constant dense<0.000000e+00> : vector<16x128xf32>
    %141 = tpu.matmul %139, %140, %cst_73 {dimension_numbers = #tpu.dot_dimension_numbers<[1], [0], [0], [1], [0, 0, 1, 1], [], []>} : vector<16x128xbf16>, vector<128x128xbf16>, vector<16x128xf32> -> vector<16x128xf32>
    %c0_74 = arith.constant 0 : index
    %c0_75 = arith.constant 0 : index
    %142 = vector.load %arg21[%c0_74, %c0_75] : memref<1x128xf32, #tpu.memory_space<vmem>>, vector<1x128xf32>
    %143 = vector.broadcast %142 : vector<1x128xf32> to vector<16x128xf32>
    %144 = arith.addf %141, %143 : vector<16x128xf32>
    %cst_76 = arith.constant 0.000000e+00 : f32
    %145 = vector.broadcast %cst_76 : f32 to vector<16x128xf32>
    %146 = arith.maximumf %144, %145 : vector<16x128xf32>
    %cst_77 = arith.constant dense<0.000000e+00> : vector<128xf32>
    %147 = vector.multi_reduction <add>, %146, %cst_77 [0] : vector<16x128xf32> to vector<128xf32>
    %148 = vector.shape_cast %147 : vector<128xf32> to vector<1x128xf32>
    %cst_78 = arith.constant 1.600000e+01 : f32
    %149 = vector.broadcast %cst_78 : f32 to vector<1x128xf32>
    %150 = arith.divf %148, %149 : vector<1x128xf32>
    %151 = arith.mulf %146, %146 : vector<16x128xf32>
    %cst_79 = arith.constant dense<0.000000e+00> : vector<128xf32>
    %152 = vector.multi_reduction <add>, %151, %cst_79 [0] : vector<16x128xf32> to vector<128xf32>
    %153 = vector.shape_cast %152 : vector<128xf32> to vector<1x128xf32>
    %cst_80 = arith.constant 1.600000e+01 : f32
    %154 = vector.broadcast %cst_80 : f32 to vector<1x128xf32>
    %155 = arith.divf %153, %154 : vector<1x128xf32>
    %156 = arith.mulf %150, %150 : vector<1x128xf32>
    %157 = arith.subf %155, %156 : vector<1x128xf32>
    %cst_81 = arith.constant 0.000000e+00 : f32
    %158 = vector.broadcast %cst_81 : f32 to vector<1x128xf32>
    %159 = arith.maximumf %157, %158 : vector<1x128xf32>
    %c0_82 = arith.constant 0 : index
    %c0_83 = arith.constant 0 : index
    %160 = vector.load %arg22[%c0_82, %c0_83] : memref<1x128xf32, #tpu.memory_space<vmem>>, vector<1x128xf32>
    %cst_84 = arith.constant 9.99999974E-6 : f32
    %161 = vector.broadcast %cst_84 : f32 to vector<1x128xf32>
    %162 = arith.addf %159, %161 : vector<1x128xf32>
    %163 = math.rsqrt %162 : vector<1x128xf32>
    %164 = arith.mulf %160, %163 : vector<1x128xf32>
    %c0_85 = arith.constant 0 : index
    %c0_86 = arith.constant 0 : index
    %165 = vector.load %arg23[%c0_85, %c0_86] : memref<1x128xf32, #tpu.memory_space<vmem>>, vector<1x128xf32>
    %166 = arith.mulf %150, %164 : vector<1x128xf32>
    %167 = arith.subf %165, %166 : vector<1x128xf32>
    %168 = vector.broadcast %164 : vector<1x128xf32> to vector<16x128xf32>
    %169 = arith.mulf %146, %168 : vector<16x128xf32>
    %170 = vector.broadcast %167 : vector<1x128xf32> to vector<16x128xf32>
    %171 = arith.addf %169, %170 : vector<16x128xf32>
    %172 = arith.truncf %171 : vector<16x128xf32> to vector<16x128xbf16>
    %c0_87 = arith.constant 0 : index
    %c0_88 = arith.constant 0 : index
    %173 = vector.load %arg24[%c0_87, %c0_88] : memref<128x256xbf16, #tpu.memory_space<vmem>>, vector<128x256xbf16>
    %cst_89 = arith.constant dense<0.000000e+00> : vector<16x256xf32>
    %174 = tpu.matmul %172, %173, %cst_89 {dimension_numbers = #tpu.dot_dimension_numbers<[1], [0], [0], [1], [0, 0, 1, 1], [], []>} : vector<16x128xbf16>, vector<128x256xbf16>, vector<16x256xf32> -> vector<16x256xf32>
    %c0_90 = arith.constant 0 : index
    %c0_91 = arith.constant 0 : index
    %175 = vector.load %arg25[%c0_90, %c0_91] : memref<1x256xf32, #tpu.memory_space<vmem>>, vector<1x256xf32>
    %176 = vector.broadcast %175 : vector<1x256xf32> to vector<16x256xf32>
    %177 = arith.addf %174, %176 : vector<16x256xf32>
    %cst_92 = arith.constant 0.000000e+00 : f32
    %178 = vector.broadcast %cst_92 : f32 to vector<16x256xf32>
    %179 = arith.maximumf %177, %178 : vector<16x256xf32>
    %cst_93 = arith.constant dense<0.000000e+00> : vector<256xf32>
    %180 = vector.multi_reduction <add>, %179, %cst_93 [0] : vector<16x256xf32> to vector<256xf32>
    %181 = vector.shape_cast %180 : vector<256xf32> to vector<1x256xf32>
    %cst_94 = arith.constant 1.600000e+01 : f32
    %182 = vector.broadcast %cst_94 : f32 to vector<1x256xf32>
    %183 = arith.divf %181, %182 : vector<1x256xf32>
    %184 = arith.mulf %179, %179 : vector<16x256xf32>
    %cst_95 = arith.constant dense<0.000000e+00> : vector<256xf32>
    %185 = vector.multi_reduction <add>, %184, %cst_95 [0] : vector<16x256xf32> to vector<256xf32>
    %186 = vector.shape_cast %185 : vector<256xf32> to vector<1x256xf32>
    %cst_96 = arith.constant 1.600000e+01 : f32
    %187 = vector.broadcast %cst_96 : f32 to vector<1x256xf32>
    %188 = arith.divf %186, %187 : vector<1x256xf32>
    %189 = arith.mulf %183, %183 : vector<1x256xf32>
    %190 = arith.subf %188, %189 : vector<1x256xf32>
    %cst_97 = arith.constant 0.000000e+00 : f32
    %191 = vector.broadcast %cst_97 : f32 to vector<1x256xf32>
    %192 = arith.maximumf %190, %191 : vector<1x256xf32>
    %c0_98 = arith.constant 0 : index
    %c0_99 = arith.constant 0 : index
    %193 = vector.load %arg26[%c0_98, %c0_99] : memref<1x256xf32, #tpu.memory_space<vmem>>, vector<1x256xf32>
    %cst_100 = arith.constant 9.99999974E-6 : f32
    %194 = vector.broadcast %cst_100 : f32 to vector<1x256xf32>
    %195 = arith.addf %192, %194 : vector<1x256xf32>
    %196 = math.rsqrt %195 : vector<1x256xf32>
    %197 = arith.mulf %193, %196 : vector<1x256xf32>
    %c0_101 = arith.constant 0 : index
    %c0_102 = arith.constant 0 : index
    %198 = vector.load %arg27[%c0_101, %c0_102] : memref<1x256xf32, #tpu.memory_space<vmem>>, vector<1x256xf32>
    %199 = arith.mulf %183, %197 : vector<1x256xf32>
    %200 = arith.subf %198, %199 : vector<1x256xf32>
    %201 = vector.broadcast %197 : vector<1x256xf32> to vector<16x256xf32>
    %202 = arith.mulf %179, %201 : vector<16x256xf32>
    %203 = vector.broadcast %200 : vector<1x256xf32> to vector<16x256xf32>
    %204 = arith.addf %202, %203 : vector<16x256xf32>
    %205 = arith.truncf %204 : vector<16x256xf32> to vector<16x256xbf16>
    %c0_103 = arith.constant 0 : index
    %c0_104 = arith.constant 0 : index
    %206 = vector.load %arg28[%c0_103, %c0_104] : memref<256x512xbf16, #tpu.memory_space<vmem>>, vector<256x512xbf16>
    %cst_105 = arith.constant dense<0.000000e+00> : vector<16x512xf32>
    %207 = tpu.matmul %205, %206, %cst_105 {dimension_numbers = #tpu.dot_dimension_numbers<[1], [0], [0], [1], [0, 0, 1, 1], [], []>} : vector<16x256xbf16>, vector<256x512xbf16>, vector<16x512xf32> -> vector<16x512xf32>
    %c0_106 = arith.constant 0 : index
    %c0_107 = arith.constant 0 : index
    %208 = vector.load %arg29[%c0_106, %c0_107] : memref<1x512xf32, #tpu.memory_space<vmem>>, vector<1x512xf32>
    %209 = vector.broadcast %208 : vector<1x512xf32> to vector<16x512xf32>
    %210 = arith.addf %207, %209 : vector<16x512xf32>
    %211 = math.tanh %210 : vector<16x512xf32>
    %c0_108 = arith.constant 0 : index
    %c0_109 = arith.constant 0 : index
    %212 = vector.load %arg30[%c0_108, %c0_109] : memref<16x512xf32, #tpu.memory_space<vmem>>, vector<16x512xf32>
    tpu.vector_store %arg30[%c0_108, %c0_109], %211 {strides = array<i32>} : memref<16x512xf32, #tpu.memory_space<vmem>>, vector<16x512xf32>,
    return
  }
  func.func @transform_0(%arg0: i32) -> (i32, i32) {
    %c0_i32 = arith.constant 0 : i32
    %c0_i32_0 = arith.constant 0 : i32
    return %arg0, %c0_i32 : i32, i32
  }
  func.func @transform_1(%arg0: i32) -> (i32, i32) {
    %c0_i32 = arith.constant 0 : i32
    %c0_i32_0 = arith.constant 0 : i32
    %c0_i32_1 = arith.constant 0 : i32
    return %c0_i32, %c0_i32_0 : i32, i32
  }
  func.func @transform_2(%arg0: i32) -> (i32, i32) {
    %c0_i32 = arith.constant 0 : i32
    %c0_i32_0 = arith.constant 0 : i32
    %c0_i32_1 = arith.constant 0 : i32
    return %c0_i32, %c0_i32_0 : i32, i32
  }
  func.func @transform_3(%arg0: i32) -> (i32, i32) {
    %c0_i32 = arith.constant 0 : i32
    %c0_i32_0 = arith.constant 0 : i32
    %c0_i32_1 = arith.constant 0 : i32
    return %c0_i32, %c0_i32_0 : i32, i32
  }
  func.func @transform_4(%arg0: i32) -> (i32, i32) {
    %c0_i32 = arith.constant 0 : i32
    %c0_i32_0 = arith.constant 0 : i32
    %c0_i32_1 = arith.constant 0 : i32
    return %c0_i32, %c0_i32_0 : i32, i32
  }
  func.func @transform_5(%arg0: i32) -> (i32, i32) {
    %c0_i32 = arith.constant 0 : i32
    %c0_i32_0 = arith.constant 0 : i32
    %c0_i32_1 = arith.constant 0 : i32
    return %c0_i32, %c0_i32_0 : i32, i32
  }
  func.func @transform_6(%arg0: i32) -> (i32, i32) {
    %c0_i32 = arith.constant 0 : i32
    %c0_i32_0 = arith.constant 0 : i32
    %c0_i32_1 = arith.constant 0 : i32
    return %c0_i32, %c0_i32_0 : i32, i32
  }
  func.func @transform_7(%arg0: i32) -> (i32, i32) {
    %c0_i32 = arith.constant 0 : i32
    %c0_i32_0 = arith.constant 0 : i32
    %c0_i32_1 = arith.constant 0 : i32
    return %c0_i32, %c0_i32_0 : i32, i32
  }
  func.func @transform_8(%arg0: i32) -> (i32, i32) {
    %c0_i32 = arith.constant 0 : i32
    %c0_i32_0 = arith.constant 0 : i32
    %c0_i32_1 = arith.constant 0 : i32
    return %c0_i32, %c0_i32_0 : i32, i32
  }
  func.func @transform_9(%arg0: i32) -> (i32, i32) {
    %c0_i32 = arith.constant 0 : i32
    %c0_i32_0 = arith.constant 0 : i32
    %c0_i32_1 = arith.constant 0 : i32
    return %c0_i32, %c0_i32_0 : i32, i32
  }
  func.func @transform_10(%arg0: i32) -> (i32, i32) {
    %c0_i32 = arith.constant 0 : i32
    %c0_i32_0 = arith.constant 0 : i32
    %c0_i32_1 = arith.constant 0 : i32
    return %c0_i32, %c0_i32_0 : i32, i32
  }
  func.func @transform_11(%arg0: i32) -> (i32, i32) {
    %c0_i32 = arith.constant 0 : i32
    %c0_i32_0 = arith.constant 0 : i32
    %c0_i32_1 = arith.constant 0 : i32
    return %c0_i32, %c0_i32_0 : i32, i32
  }
  func.func @transform_12(%arg0: i32) -> (i32, i32) {
    %c0_i32 = arith.constant 0 : i32
    %c0_i32_0 = arith.constant 0 : i32
    %c0_i32_1 = arith.constant 0 : i32
    return %c0_i32, %c0_i32_0 : i32, i32
  }
  func.func @transform_13(%arg0: i32) -> (i32, i32) {
    %c0_i32 = arith.constant 0 : i32
    %c0_i32_0 = arith.constant 0 : i32
    %c0_i32_1 = arith.constant 0 : i32
    return %c0_i32, %c0_i32_0 : i32, i32
  }
  func.func @transform_14(%arg0: i32) -> (i32, i32) {
    %c0_i32 = arith.constant 0 : i32
    %c0_i32_0 = arith.constant 0 : i32
    %c0_i32_1 = arith.constant 0 : i32
    return %c0_i32, %c0_i32_0 : i32, i32
  }
  func.func @transform_15(%arg0: i32) -> (i32, i32) {
    %c0_i32 = arith.constant 0 : i32
    %c0_i32_0 = arith.constant 0 : i32
    %c0_i32_1 = arith.constant 0 : i32
    return %c0_i32, %c0_i32_0 : i32, i32
  }
  func.func @transform_16(%arg0: i32) -> (i32, i32) {
    %c0_i32 = arith.constant 0 : i32
    %c0_i32_0 = arith.constant 0 : i32
    %c0_i32_1 = arith.constant 0 : i32
    return %c0_i32, %c0_i32_0 : i32, i32
  }
  func.func @transform_17(%arg0: i32) -> (i32, i32) {
    %c0_i32 = arith.constant 0 : i32
    %c0_i32_0 = arith.constant 0 : i32
    %c0_i32_1 = arith.constant 0 : i32
    return %c0_i32, %c0_i32_0 : i32, i32
  }
  func.func @transform_18(%arg0: i32) -> (i32, i32) {
    %c0_i32 = arith.constant 0 : i32
    %c0_i32_0 = arith.constant 0 : i32
    %c0_i32_1 = arith.constant 0 : i32
    return %c0_i32, %c0_i32_0 : i32, i32
  }
  func.func @transform_19(%arg0: i32) -> (i32, i32) {
    %c0_i32 = arith.constant 0 : i32
    %c0_i32_0 = arith.constant 0 : i32
    %c0_i32_1 = arith.constant 0 : i32
    return %c0_i32, %c0_i32_0 : i32, i32
  }
  func.func @transform_20(%arg0: i32) -> (i32, i32) {
    %c0_i32 = arith.constant 0 : i32
    %c0_i32_0 = arith.constant 0 : i32
    %c0_i32_1 = arith.constant 0 : i32
    return %c0_i32, %c0_i32_0 : i32, i32
  }
  func.func @transform_21(%arg0: i32) -> (i32, i32) {
    %c0_i32 = arith.constant 0 : i32
    %c0_i32_0 = arith.constant 0 : i32
    %c0_i32_1 = arith.constant 0 : i32
    return %c0_i32, %c0_i32_0 : i32, i32
  }
  func.func @transform_22(%arg0: i32) -> (i32, i32) {
    %c0_i32 = arith.constant 0 : i32
    %c0_i32_0 = arith.constant 0 : i32
    %c0_i32_1 = arith.constant 0 : i32
    return %c0_i32, %c0_i32_0 : i32, i32
  }
  func.func @transform_23(%arg0: i32) -> (i32, i32) {
    %c0_i32 = arith.constant 0 : i32
    %c0_i32_0 = arith.constant 0 : i32
    %c0_i32_1 = arith.constant 0 : i32
    return %c0_i32, %c0_i32_0 : i32, i32
  }
  func.func @transform_24(%arg0: i32) -> (i32, i32) {
    %c0_i32 = arith.constant 0 : i32
    %c0_i32_0 = arith.constant 0 : i32
    %c0_i32_1 = arith.constant 0 : i32
    return %c0_i32, %c0_i32_0 : i32, i32
  }
  func.func @transform_25(%arg0: i32) -> (i32, i32) {
    %c0_i32 = arith.constant 0 : i32
    %c0_i32_0 = arith.constant 0 : i32
    %c0_i32_1 = arith.constant 0 : i32
    return %c0_i32, %c0_i32_0 : i32, i32
  }
  func.func @transform_26(%arg0: i32) -> (i32, i32) {
    %c0_i32 = arith.constant 0 : i32
    %c0_i32_0 = arith.constant 0 : i32
    %c0_i32_1 = arith.constant 0 : i32
    return %c0_i32, %c0_i32_0 : i32, i32
  }
  func.func @transform_27(%arg0: i32) -> (i32, i32) {
    %c0_i32 = arith.constant 0 : i32
    %c0_i32_0 = arith.constant 0 : i32
    %c0_i32_1 = arith.constant 0 : i32
    return %c0_i32, %c0_i32_0 : i32, i32
  }
  func.func @transform_28(%arg0: i32) -> (i32, i32) {
    %c0_i32 = arith.constant 0 : i32
    %c0_i32_0 = arith.constant 0 : i32
    %c0_i32_1 = arith.constant 0 : i32
    return %c0_i32, %c0_i32_0 : i32, i32
  }
  func.func @transform_29(%arg0: i32) -> (i32, i32) {
    %c0_i32 = arith.constant 0 : i32
    %c0_i32_0 = arith.constant 0 : i32
    return %arg0, %c0_i32 : i32, i32
  }
  func.func @transform_30(%arg0: i32) -> (i32, i32) {
    %c0_i32 = arith.constant 0 : i32
    %c0_i32_0 = arith.constant 0 : i32
    return %arg0, %c0_i32 : i32, i32
  }
}

</mosaic_0001>

<bundles_post_ra>
// kernel: tpu_custom_call.1
= control target key start
LH: loop header
LB: loop body
LE: loop exit
PB: predicated region body
PF: predicated region fallthrough
CT: control target
= control target key end

     0   :  { %s3610_s6 = smov 1   ;;  %s3611_s10 = smov 2   ;;  %s4013_s0 = inlined_call_operand.smem [shape: u32[31], index: -1, kind: input, shape index: {}] }
   0x1   :  { %s3675_s5 = sld [smem:[%s4013_s0]]   ;;  %s3612_s14 = smov 3  }
   0x2   :  { %s3680_s9 = sld [smem:[%s4013_s0 + %s3610_s6]]   ;;  %s3613_s18 = smov 4  }
   0x3   :  { %s3685_s13 = sld [smem:[%s4013_s0 + %s3611_s10]]   ;;  %s3614_s22 = smov 5  }
   0x4   :  { %s3690_s17 = sld [smem:[%s4013_s0 + %s3612_s14]]   ;;  %s3615_s26 = smov 6  }
   0x5   :  { %s3695_s21 = sld [smem:[%s4013_s0 + %s3613_s18]]   ;;  %s3616_s30 = smov 7  }
   0x6   :  { %s3700_s25 = sld [smem:[%s4013_s0 + %s3614_s22]]   ;;  %s3617_s4 = smov 8  }
   0x7   :  { %s3705_s29 = sld [smem:[%s4013_s0 + %s3615_s26]]   ;;  %s3618_s10 = smov 9  }
   0x8   :  { %s3710_s3 = sld [smem:[%s4013_s0 + %s3616_s30]]   ;;  %s3619_s15 = smov 10  }
   0x9   :  { %s3715_s8 = sld [smem:[%s4013_s0 + %s3617_s4]]   ;;  %s3620_s20 = smov 11  }
   0xa   :  { %s3720_s14 = sld [smem:[%s4013_s0 + %s3618_s10]]   ;;  %s3621_s26 = smov 12  }
   0xb   :  { %s3725_s19 = sld [smem:[%s4013_s0 + %s3619_s15]]   ;;  %s3622_s1 = smov 13  }
   0xc   :  { %s3730_s24 = sld [smem:[%s4013_s0 + %s3620_s20]]   ;;  %s3623_s7 = smov 14  }
   0xd   :  { %s3735_s30 = sld [smem:[%s4013_s0 + %s3621_s26]]   ;;  %s3624_s15 = smov 15  }
   0xe   :  { %s3740_s6 = sld [smem:[%s4013_s0 + %s3622_s1]]   ;;  %s3625_s22 = smov 16  }
   0xf   :  { %s3745_s12 = sld [smem:[%s4013_s0 + %s3623_s7]]   ;;  %s3626_s28 = smov 17  }
  0x10   :  { %s3750_s20 = sld [smem:[%s4013_s0 + %s3624_s15]]   ;;  %s3627_s7 = smov 18  }
  0x11   :  { %4014 = sst [smem:[#allocation35_spill]] %s3725_s19  ;;  %s3628_s15 = smov 19  }
  0x12   :  { %4015 = sst [smem:[#allocation36_spill]] %s3730_s24 }
  0x13   :  { %4016 = sst [smem:[#allocation37_spill]] %s3735_s30 }
  0x14   :  { %s3755_s27 = sld [smem:[%s4013_s0 + %s3625_s22]]   ;;  %s3629_s22 = smov 20  }
  0x15   :  { %4017 = sst [smem:[#allocation38_spill]] %s3745_s12 }
  0x16   :  { %s3760_s4 = sld [smem:[%s4013_s0 + %s3626_s28]]   ;;  %s3630_s28 = smov 21  }
  0x17   :  { %s3765_s12 = sld [smem:[%s4013_s0 + %s3627_s7]]   ;;  %s3631_s7 = smov 22  }
  0x18   :  { %s3770_s30 = sld [smem:[%s4013_s0 + %s3628_s15]]   ;;  %s3632_s15 = smov 23  }
  0x19   :  { %s3790_s24 = sld [smem:[%s4013_s0 + %s3632_s15]]   ;;  %s3636_s15 = smov 27  }
  0x1a   :  { %4018 = sst [smem:[#allocation39_spill]] %s3755_s27 }
  0x1b   :  { %s3775_s27 = sld [smem:[%s4013_s0 + %s3629_s22]]   ;;  %s3633_s22 = smov 24  }
  0x1c   :  { %4019 = sst [smem:[#allocation40_spill]] %s3760_s4 }
  0x1d   :  { %4020 = sst [smem:[#allocation41_spill]] %s3765_s12 }
  0x1e   :  { %s3780_s4 = sld [smem:[%s4013_s0 + %s3630_s28]]   ;;  %s3634_s28 = smov 25  }
  0x1f   :  { %s3785_s12 = sld [smem:[%s4013_s0 + %s3631_s7]]   ;;  %s3635_s7 = smov 26  }
  0x20   :  { %s3810_s19 = sld [smem:[%s4013_s0 + %s3636_s15]]  }
  0x21   :  { %4021 = sst [smem:[#allocation42_spill]] %s3775_s27 }
  0x22   :  { %s3795_s27 = sld [smem:[%s4013_s0 + %s3633_s22]]   ;;  %s3637_s22 = smov 28  }
  0x24   :  { %4022 = sst [smem:[#allocation43_spill]] %s3780_s4 }
  0x25   :  { %4023 = sst [smem:[#allocation44_spill]] %s3785_s12 }
  0x26   :  { %s3800_s4 = sld [smem:[%s4013_s0 + %s3634_s28]]   ;;  %s3638_s28 = smov 29  }
  0x27   :  { %s3805_s12 = sld [smem:[%s4013_s0 + %s3635_s7]]   ;;  %s3639_s7 = smov 30  }
  0x28   :  { %4024 = sst [smem:[#allocation45_spill]] %s3795_s27 }
  0x29   :  { %s3815_s27 = sld [smem:[%s4013_s0 + %s3637_s22]]  }
  0x2c   :  { %4025 = sst [smem:[#allocation46_spill]] %s3800_s4 }
  0x2d   :  { %4026 = sst [smem:[#allocation47_spill]] %s3805_s12 }
  0x2e   :  { %s3820_s4 = sld [smem:[%s4013_s0 + %s3638_s28]]  }
  0x2f   :  { %s3825_s12 = sld [smem:[%s4013_s0 + %s3639_s7]]  }
  0x30   :  { %67 = vsyncpa [#allocation3], 0 }
  0x31   :  { %68 = vsyncpa [#allocation6], 0 }
  0x32   :  { %69 = vsyncpa [#allocation9], 0 }
  0x33   :  { %70 = vsyncpa [#allocation12], 0 }
  0x34   :  { %71 = vsyncpa [#allocation15], 0 }
  0x35   :  { %72 = vsyncpa [#allocation18], 0 }
  0x36   :  { %73 = vsyncpa [#allocation21], 0 }
  0x37   :  { %74 = vsyncpa [#allocation4], 0 }
  0x38   :  { %75 = vsyncpa [#allocation25], 0  ;;  %s3640_s15 = smov [#allocation5]  }
  0x39   :  { %s93_s16 = sshll.u32 %s3640_s15, 4  ;;  %s94_s16 = int_to_ptr.vmem [resolvable:$true] %s93_s16 }
  0x3a   :  { %s3300_s18 = scalar_lea.vmem %s94_s16, 8192  ;;  %p3305_p1 = scmp.lt.s32.totalorder %s94_s16, %s94_s16 }
  0x3b   :  { %p3301_p0 = scmp.ne.s32.totalorder %s94_s16, %s3300_s18  ;;  %p3306_p2 = scmp.lt.s32.totalorder %s3300_s18, %s3300_s18 }
  0x3d   :  { %p3307_p3 = por %p3306_p2, %p3305_p1 }
  0x3f   :  { %p3308_p4 = pnand %p3307_p3, %p3301_p0 }
  0x41   :  { %3311 = shalt.err (!%p3308_p4)
}
  0x42   :  { %s3641_s0 = smov 128   ;;  %s3642_s22 = smov 8  }
  0x43   :  { %99 = dma.hbm_to_vmem [thread:$0]  %s3680_s9, 8192, %s94_s16, [#allocation6], %s3641_s0, %s3641_s0, %s3642_s22  }
  0x44   :  { %s3643_s23 = smov [#allocation8]   ;;  %s3644_s28 = smov [#allocation11]  }
  0x45   :  { %s118_s26 = sshll.u32 %s3643_s23, 4  ;;  %s140_s1 = sshll.u32 %s3644_s28, 4  ;;  %s119_s26 = int_to_ptr.vmem [resolvable:$true] %s118_s26  ;;  %s141_s1 = int_to_ptr.vmem [resolvable:$true] %s140_s1 }
  0x46   :  { %s3320_s2 = scalar_lea.vmem %s119_s26, 32  ;;  %p3325_p6 = scmp.lt.s32.totalorder %s119_s26, %s119_s26 }
  0x47   :  { %p3321_p5 = scmp.ne.s32.totalorder %s119_s26, %s3320_s2  ;;  %p3326_p7 = scmp.lt.s32.totalorder %s3320_s2, %s3320_s2 }
  0x49   :  { %p3327_p8 = por %p3326_p7, %p3325_p6 }
  0x4b   :  { %p3328_p9 = pnand %p3327_p8, %p3321_p5 }
  0x4d   :  { %3331 = shalt.err (!%p3328_p9)
}
  0x4e   :  { %121 = dma.hbm_to_vmem [thread:$0]  %s3695_s21, 32, %s119_s26, [#allocation9]  }
  0x4f   :  { %s3340_s7 = scalar_lea.vmem %s141_s1, 16  ;;  %s3344_s10 = scalar_lea.vmem %s141_s1, 32 }
  0x50   :  { %p3341_p10 = scmp.ne.s32.totalorder %s141_s1, %s3340_s7  ;;  %p3345_p11 = scmp.lt.s32.totalorder %s141_s1, %s141_s1 }
  0x51   :  { %p3346_p12 = scmp.lt.s32.totalorder %s3344_s10, %s3340_s7 }
  0x53   :  { %p3347_p13 = por %p3346_p12, %p3345_p11 }
  0x55   :  { %p3348_p0 = pnand %p3347_p13, %p3341_p10 }
  0x57   :  { %3351 = shalt.err (!%p3348_p0)
}
  0x58   :  { %143 = dma.hbm_to_vmem [thread:$0]  %s3705_s29, 16, %s141_s1, [#allocation12]  }
  0x59   :  { %s3645_s9 = smov [#allocation14]   ;;  %s3646_s15 = smov [#allocation17]  }
  0x5a   :  { %s161_s11 = sshll.u32 %s3645_s9, 4  ;;  %s193_s16 = sshll.u32 %s3646_s15, 4  ;;  %s162_s11 = int_to_ptr.vmem [resolvable:$true] %s161_s11  ;;  %s194_s16 = int_to_ptr.vmem [resolvable:$true] %s193_s16 }
  0x5b   :  { %s3360_s18 = scalar_lea.vmem %s162_s11, 1024  ;;  %p3365_p2 = scmp.lt.s32.totalorder %s162_s11, %s162_s11 }
  0x5c   :  { %p3361_p1 = scmp.ne.s32.totalorder %s162_s11, %s3360_s18  ;;  %p3366_p3 = scmp.lt.s32.totalorder %s3360_s18, %s3360_s18 }
  0x5e   :  { %p3367_p4 = por %p3366_p3, %p3365_p2 }
  0x60   :  { %p3368_p5 = pnand %p3367_p4, %p3361_p1 }
  0x62   :  { %3371 = shalt.err (!%p3368_p5)
}
  0x63   :  { %s3647_s21 = smov 64   ;;  %s3648_s23 = smov 4  }
  0x64   :  { %167 = dma.hbm_to_vmem [thread:$0]  %s3720_s14, 1024, %s162_s11, [#allocation15], %s3647_s21, %s3647_s21, %s3648_s23  }
  0x65   :  { %s3380_s29 = scalar_lea.vmem %s194_s16, 1024  ;;  %p3385_p7 = scmp.lt.s32.totalorder %s194_s16, %s194_s16 }
  0x66   :  { %p3381_p6 = scmp.ne.s32.totalorder %s194_s16, %s3380_s29  ;;  %p3386_p8 = scmp.lt.s32.totalorder %s3380_s29, %s3380_s29 }
  0x68   :  { %p3387_p9 = por %p3386_p8, %p3385_p7 }
  0x6a   :  { %p3388_p10 = pnand %p3387_p9, %p3381_p6 }
  0x6c   :  { %3391 = shalt.err (!%p3388_p10)
}
  0x6d   :  { %199 = dma.hbm_to_vmem [thread:$0]  %s3750_s20, 1024, %s194_s16, [#allocation18], %s3647_s21, %s3647_s21, %s3648_s23  }
  0x6e   :  { %s3649_s26 = smov [#allocation20]   ;;  %s3650_s1 = smov [#allocation2]  }
  0x6f   :  { %s229_s28 = sshll.u32 %s3649_s26, 4  ;;  %s81_s2 = sshll.u32 %s3650_s1, 4  ;;  %s230_s28 = int_to_ptr.vmem [resolvable:$true] %s229_s28  ;;  %s82_s2 = int_to_ptr.vmem [resolvable:$true] %s81_s2 }
  0x70   :  { %s3400_s7 = scalar_lea.vmem %s230_s28, 2048  ;;  %p3405_p12 = scmp.lt.s32.totalorder %s230_s28, %s230_s28 }
  0x71   :  { %p3401_p11 = scmp.ne.s32.totalorder %s230_s28, %s3400_s7  ;;  %p3406_p13 = scmp.lt.s32.totalorder %s3400_s7, %s3400_s7 }
  0x73   :  { %p3407_p0 = por %p3406_p13, %p3405_p12 }
  0x75   :  { %p3408_p1 = pnand %p3407_p0, %p3401_p11 }
  0x77   :  { %3411 = shalt.err (!%p3408_p1)
}
  0x78   :  { %235 = dma.hbm_to_vmem [thread:$0]  %s3790_s24, 2048, %s230_s28, [#allocation21], %s3641_s0, %s3641_s0, %s3642_s22  }
  0x79   :  { %s3420_s14 = scalar_lea.vmem %s82_s2, 512  ;;  %p3425_p3 = scmp.lt.s32.totalorder %s82_s2, %s82_s2 }
  0x7a   :  { %p3421_p2 = scmp.ne.s32.totalorder %s82_s2, %s3420_s14  ;;  %p3426_p4 = scmp.lt.s32.totalorder %s3420_s14, %s3420_s14 }
  0x7c   :  { %p3427_p5 = por %p3426_p4, %p3425_p3 }
  0x7e   :  { %p3428_p6 = pnand %p3427_p5, %p3421_p2 }
  0x80   :  { %3431 = shalt.err (!%p3428_p6)
}
  0x81   :  { %s3651_s20 = smov 256   ;;  %s3652_s10 = smov 16  }
  0x82   :  { %87 = dma.hbm_to_vmem [thread:$0]  %s3675_s5, 512, %s82_s2, [#allocation3], %s3651_s20, %s3651_s20, %s3652_s10  }
  0x83   :  { %s3653_s9 = smov [#allocation7]   ;;  %s3654_s15 = smov [#allocation10]  }
  0x84   :  { %s108_s11 = sshll.u32 %s3653_s9, 4  ;;  %s127_s24 = sshll.u32 %s3654_s15, 4  ;;  %s109_s11 = int_to_ptr.vmem [resolvable:$true] %s108_s11  ;;  %s128_s24 = int_to_ptr.vmem [resolvable:$true] %s127_s24 }
  0x85   :  { %s3440_s16 = scalar_lea.vmem %s109_s11, 32  ;;  %p3445_p8 = scmp.lt.s32.totalorder %s109_s11, %s109_s11 }
  0x86   :  { %p3441_p7 = scmp.ne.s32.totalorder %s109_s11, %s3440_s16  ;;  %p3446_p9 = scmp.lt.s32.totalorder %s3440_s16, %s3440_s16 }
  0x88   :  { %p3447_p10 = por %p3446_p9, %p3445_p8 }
  0x8a   :  { %p3448_p11 = pnand %p3447_p10, %p3441_p7 }
  0x8c   :  { %3451 = shalt.err (!%p3448_p11)
}
  0x8d   :  { %111 = dma.hbm_to_vmem [thread:$0]  %s3690_s17, 32, %s109_s11, [#allocation6]  }
  0x8e   :  { %s3460_s18 = scalar_lea.vmem %s128_s24, 2048  ;;  %p3465_p13 = scmp.lt.s32.totalorder %s128_s24, %s128_s24 }
  0x8f   :  { %p3461_p12 = scmp.ne.s32.totalorder %s128_s24, %s3460_s18  ;;  %p3466_p0 = scmp.lt.s32.totalorder %s3460_s18, %s3460_s18 }
  0x91   :  { %p3467_p1 = por %p3466_p0, %p3465_p13 }
  0x93   :  { %p3468_p2 = pnand %p3467_p1, %p3461_p12 }
  0x95   :  { %3471 = shalt.err (!%p3468_p2)
}
  0x96   :  { %133 = dma.hbm_to_vmem [thread:$0]  %s3700_s25, 2048, %s128_s24, [#allocation9], %s3647_s21, %s3647_s21, %s3648_s23  }
  0x97   :  { %s3655_s5 = smov [#allocation13]   ;;  %s3656_s26 = smov [#allocation16]  }
  0x98   :  { %s150_s29 = sshll.u32 %s3655_s5, 4  ;;  %s179_s28 = sshll.u32 %s3656_s26, 4  ;;  %s151_s29 = int_to_ptr.vmem [resolvable:$true] %s150_s29  ;;  %s180_s28 = int_to_ptr.vmem [resolvable:$true] %s179_s28 }
  0x99   :  { %s3480_s1 = scalar_lea.vmem %s151_s29, 16  ;;  %s3484_s17 = scalar_lea.vmem %s151_s29, 32 }
  0x9a   :  { %p3481_p3 = scmp.ne.s32.totalorder %s151_s29, %s3480_s1  ;;  %p3485_p4 = scmp.lt.s32.totalorder %s151_s29, %s151_s29 }
  0x9b   :  { %p3486_p5 = scmp.lt.s32.totalorder %s3484_s17, %s3480_s1 }
  0x9d   :  { %p3487_p6 = por %p3486_p5, %p3485_p4 }
  0x9f   :  { %p3488_p7 = pnand %p3487_p6, %p3481_p3 }
  0xa1   :  { %3491 = shalt.err (!%p3488_p7)
}
  0xa2   :  { %153 = dma.hbm_to_vmem [thread:$0]  %s3710_s3, 16, %s151_s29, [#allocation12]  }
  0xa3   :  { %s3500_s2 = scalar_lea.vmem %s180_s28, 1024  ;;  %p3505_p9 = scmp.lt.s32.totalorder %s180_s28, %s180_s28 }
  0xa4   :  { %p3501_p8 = scmp.ne.s32.totalorder %s180_s28, %s3500_s2  ;;  %p3506_p10 = scmp.lt.s32.totalorder %s3500_s2, %s3500_s2 }
  0xa6   :  { %p3507_p11 = por %p3506_p10, %p3505_p9 }
  0xa8   :  { %p3508_p12 = pnand %p3507_p11, %p3501_p8 }
  0xaa   :  { %3511 = shalt.err (!%p3508_p12)
}
  0xab   :  { %185 = dma.hbm_to_vmem [thread:$0]  %s3740_s6, 1024, %s180_s28, [#allocation15], %s3647_s21, %s3647_s21, %s3648_s23  }
  0xac   :  { %s3657_s25 = smov [#allocation19]   ;;  %s3658_s14 = smov [#allocation22]  }
  0xad   :  { %s211_s7 = sshll.u32 %s3657_s25, 4  ;;  %s247_s9 = sshll.u32 %s3658_s14, 4  ;;  %s212_s7 = int_to_ptr.vmem [resolvable:$true] %s211_s7  ;;  %s248_s9 = int_to_ptr.vmem [resolvable:$true] %s247_s9 }
  0xae   :  { %s3520_s11 = scalar_lea.vmem %s212_s7, 1024  ;;  %p3525_p0 = scmp.lt.s32.totalorder %s212_s7, %s212_s7 }
  0xaf   :  { %p3521_p13 = scmp.ne.s32.totalorder %s212_s7, %s3520_s11  ;;  %p3526_p1 = scmp.lt.s32.totalorder %s3520_s11, %s3520_s11 }
  0xb1   :  { %p3527_p2 = por %p3526_p1, %p3525_p0 }
  0xb3   :  { %p3528_p3 = pnand %p3527_p2, %p3521_p13 }
  0xb5   :  { %3531 = shalt.err (!%p3528_p3)
}
  0xb6   :  { %217 = dma.hbm_to_vmem [thread:$0]  %s3770_s30, 1024, %s212_s7, [#allocation18], %s3647_s21, %s3647_s21, %s3648_s23  }
  0xb7   :  { %s3540_s3 = scalar_lea.vmem %s248_s9, 8192  ;;  %p3545_p5 = scmp.lt.s32.totalorder %s248_s9, %s248_s9 }
  0xb8   :  { %p3541_p4 = scmp.ne.s32.totalorder %s248_s9, %s3540_s3  ;;  %p3546_p6 = scmp.lt.s32.totalorder %s3540_s3, %s3540_s3 }
  0xba   :  { %p3547_p7 = por %p3546_p6, %p3545_p5 }
  0xbc   :  { %p3548_p8 = pnand %p3547_p7, %p3541_p4 }
  0xbe   :  { %3551 = shalt.err (!%p3548_p8)
}
  0xbf   :  { %253 = dma.hbm_to_vmem [thread:$0]  %s3810_s19, 8192, %s248_s9, [#allocation21], %s3651_s20, %s3651_s20, %s3652_s10  }
  0xc0   :  { %3592 = dma.done.wait [#allocation3], 512  }
  0xc1   :  { %3593 = vsyncadd [#allocation3], 4294966784 }
  0xc2   :  { %3594 = dma.done.wait [#allocation6], 8224  }
  0xc3   :  { %3595 = vsyncadd [#allocation6], 4294959072 }
  0xc4   :  { %3596 = dma.done.wait [#allocation9], 2080  }
  0xc5   :  { %3597 = vsyncadd [#allocation9], 4294965216 }
  0xc6   :  { %3598 = dma.done.wait [#allocation12], 32  }
  0xc7   :  { %3599 = vsyncadd [#allocation12], 4294967264 }
  0xc8   :  { %3600 = dma.done.wait [#allocation15], 2048  }
  0xc9   :  { %3601 = vsyncadd [#allocation15], 4294965248 }
  0xca   :  { %3602 = dma.done.wait [#allocation18], 2048  }
  0xcb   :  { %3603 = vsyncadd [#allocation18], 4294965248 }
  0xcc   :  { %3604 = dma.done.wait [#allocation21], 10240  }
  0xcd   :  { %3605 = vsyncadd [#allocation21], 4294957056  ;;  %v2990_v0 = vld [vmem:[#allocation5 + $0x74] ss:$8 sps:$4 sm:$0xff]   ;;  %v2994_v2 = vld [vmem:[#allocation5 + $0x70] ss:$8 sps:$4 sm:$0xff]  }
  0xce   :  { %v2992_v1 = vld [vmem:[#allocation5 + $0x174] ss:$8 sps:$4 sm:$0xff]   ;;  %716 = vmatprep.subr.bf16.mxu0 %v2990_v0  ;;  %v2995_v3 = vld [vmem:[#allocation5 + $0x170] ss:$8 sps:$4 sm:$0xff]   ;;  %v2996_v4 = vld [vmem:[#allocation5 + $0x64] ss:$8 sps:$4 sm:$0xff]  }
  0xcf   :  { %759 = vmatprep.subr.bf16.mxu1 %v2992_v1  ;;  %717 = vmatpush1.bf16.msra.mxu0 %v2994_v2  ;;  %v2998_v5 = vld [vmem:[#allocation5 + $0x164] ss:$8 sps:$4 sm:$0xff]   ;;  %v3000_v6 = vld [vmem:[#allocation5 + $0x60] ss:$8 sps:$4 sm:$0xff]   ;;  %v3002_v8 = vld [vmem:[#allocation5 + $0x54] ss:$8 sps:$4 sm:$0xff]  }
  0xd0   :  { %760 = vmatpush1.bf16.msra.mxu1 %v2995_v3  ;;  %718 = vmatprep.subr.bf16.mxu0 %v2996_v4  ;;  %v3001_v7 = vld [vmem:[#allocation5 + $0x160] ss:$8 sps:$4 sm:$0xff]   ;;  %v3004_v9 = vld [vmem:[#allocation5 + $0x154] ss:$8 sps:$4 sm:$0xff]   ;;  %v3006_v10 = vld [vmem:[#allocation5 + $0x50] ss:$8 sps:$4 sm:$0xff]  }
  0xd1   :  { %761 = vmatprep.subr.bf16.mxu1 %v2998_v5  ;;  %v3007_v11 = vld [vmem:[#allocation5 + $0x150] ss:$8 sps:$4 sm:$0xff]   ;;  %v3008_v12 = vld [vmem:[#allocation5 + $0x44] ss:$8 sps:$4 sm:$0xff]   ;;  %v3012_v14 = vld [vmem:[#allocation5 + $0x40] ss:$8 sps:$4 sm:$0xff]  }
  0xd2   :  { %v3010_v13 = vld [vmem:[#allocation5 + $0x144] ss:$8 sps:$4 sm:$0xff]   ;;  %v3013_v15 = vld [vmem:[#allocation5 + $0x140] ss:$8 sps:$4 sm:$0xff]   ;;  %v3014_v16 = vld [vmem:[#allocation5 + $0x34] ss:$8 sps:$4 sm:$0xff]  }
  0xd3   :  { %719 = vmatpush1.bf16.msra.mxu0 %v3000_v6  ;;  %v3016_v17 = vld [vmem:[#allocation5 + $0x134] ss:$8 sps:$4 sm:$0xff]   ;;  %v3018_v18 = vld [vmem:[#allocation5 + $0x30] ss:$8 sps:$4 sm:$0xff]   ;;  %v3020_v20 = vld [vmem:[#allocation5 + $0x24] ss:$8 sps:$4 sm:$0xff]  }
  0xd4   :  { %762 = vmatpush1.bf16.msra.mxu1 %v3001_v7  ;;  %720 = vmatprep.subr.bf16.mxu0 %v3002_v8  ;;  %v3019_v19 = vld [vmem:[#allocation5 + $0x130] ss:$8 sps:$4 sm:$0xff]   ;;  %v3022_v21 = vld [vmem:[#allocation5 + $0x124] ss:$8 sps:$4 sm:$0xff]   ;;  %v3024_v22 = vld [vmem:[#allocation5 + $0x20] ss:$8 sps:$4 sm:$0xff]  }
  0xd5   :  { %763 = vmatprep.subr.bf16.mxu1 %v3004_v9  ;;  %v3025_v23 = vld [vmem:[#allocation5 + $0x120] ss:$8 sps:$4 sm:$0xff]   ;;  %v3026_v24 = vld [vmem:[#allocation5 + $0x14] ss:$8 sps:$4 sm:$0xff]   ;;  %v3030_v26 = vld [vmem:[#allocation5 + $0x10] ss:$8 sps:$4 sm:$0xff]  }
  0xd6   :  { %v3028_v25 = vld [vmem:[#allocation5 + $0x114] ss:$8 sps:$4 sm:$0xff]   ;;  %v3031_v27 = vld [vmem:[#allocation5 + $0x110] ss:$8 sps:$4 sm:$0xff]   ;;  %v3032_v28 = vld [vmem:[#allocation5 + $0x4] ss:$8 sps:$4 sm:$0xff]  }
  0xd7   :  { %721 = vmatpush1.bf16.msra.mxu0 %v3006_v10  ;;  %v3034_v29 = vld [vmem:[#allocation5 + $0x104] ss:$8 sps:$4 sm:$0xff]   ;;  %v3036_v30 = vld [vmem:[#allocation5] ss:$8 sps:$4 sm:$0xff]   ;;  %v3038_v32 = vld [vmem:[#allocation5 + $0xf4] ss:$8 sps:$4 sm:$0xff]  }
  0xd8   :  { %764 = vmatpush1.bf16.msra.mxu1 %v3007_v11  ;;  %722 = vmatprep.subr.bf16.mxu0 %v3008_v12  ;;  %v3037_v31 = vld [vmem:[#allocation5 + $0x100] ss:$8 sps:$4 sm:$0xff]   ;;  %v3040_v33 = vld [vmem:[#allocation5 + $0x1f4] ss:$8 sps:$4 sm:$0xff]   ;;  %v3042_v34 = vld [vmem:[#allocation5 + $0xf0] ss:$8 sps:$4 sm:$0xff]  }
  0xd9   :  { %765 = vmatprep.subr.bf16.mxu1 %v3010_v13  ;;  %v3043_v35 = vld [vmem:[#allocation5 + $0x1f0] ss:$8 sps:$4 sm:$0xff]   ;;  %v3044_v36 = vld [vmem:[#allocation5 + $0xe4] ss:$8 sps:$4 sm:$0xff]   ;;  %v3048_v38 = vld [vmem:[#allocation5 + $0xe0] ss:$8 sps:$4 sm:$0xff]  }
  0xda   :  { %v3046_v37 = vld [vmem:[#allocation5 + $0x1e4] ss:$8 sps:$4 sm:$0xff]   ;;  %v3049_v39 = vld [vmem:[#allocation5 + $0x1e0] ss:$8 sps:$4 sm:$0xff]   ;;  %v3050_v40 = vld [vmem:[#allocation5 + $0xd4] ss:$8 sps:$4 sm:$0xff]  }
  0xdb   :  { %723 = vmatpush1.bf16.msra.mxu0 %v3012_v14  ;;  %v3052_v41 = vld [vmem:[#allocation5 + $0x1d4] ss:$8 sps:$4 sm:$0xff]   ;;  %v3054_v42 = vld [vmem:[#allocation5 + $0xd0] ss:$8 sps:$4 sm:$0xff]   ;;  %v3056_v44 = vld [vmem:[#allocation5 + $0xc4] ss:$8 sps:$4 sm:$0xff]  }
  0xdc   :  { %766 = vmatpush1.bf16.msra.mxu1 %v3013_v15  ;;  %724 = vmatprep.subr.bf16.mxu0 %v3014_v16  ;;  %v3055_v43 = vld [vmem:[#allocation5 + $0x1d0] ss:$8 sps:$4 sm:$0xff]   ;;  %v3058_v45 = vld [vmem:[#allocation5 + $0x1c4] ss:$8 sps:$4 sm:$0xff]   ;;  %v3060_v46 = vld [vmem:[#allocation5 + $0xc0] ss:$8 sps:$4 sm:$0xff]  }
  0xdd   :  { %767 = vmatprep.subr.bf16.mxu1 %v3016_v17  ;;  %v3061_v47 = vld [vmem:[#allocation5 + $0x1c0] ss:$8 sps:$4 sm:$0xff]   ;;  %v3088_v48 = vld [vmem:[#allocation2 + $0x4] ss:$16 sps:$4 sm:$0xff]   ;;  %v3091_v51 = vld [vmem:[#allocation2 + $0xc] ss:$16 sps:$4 sm:$0xff]  }
  0xde   :  { %v3062_v49 = vld [vmem:[#allocation5 + $0xb4] ss:$8 sps:$4 sm:$0xff]   ;;  %v3066_v52 = vld [vmem:[#allocation5 + $0xb0] ss:$8 sps:$4 sm:$0xff]   ;;  %748 = vmatprep.mubr.bf16.mxu0 %v3088_v48  ;;  %v3068_v54 = vld [vmem:[#allocation5 + $0xa4] ss:$8 sps:$4 sm:$0xff]   ;;  %791 = vmatprep.mubr.bf16.mxu1 %v3091_v51 }
  0xdf   :  { %725 = vmatpush1.bf16.msra.mxu0 %v3018_v18  ;;  %v3064_v50 = vld [vmem:[#allocation5 + $0x1b4] ss:$8 sps:$4 sm:$0xff]   ;;  %v3067_v53 = vld [vmem:[#allocation5 + $0x1b0] ss:$8 sps:$4 sm:$0xff]   ;;  %v3070_v55 = vld [vmem:[#allocation5 + $0x1a4] ss:$8 sps:$4 sm:$0xff]  }
  0xe0   :  { %768 = vmatpush1.bf16.msra.mxu1 %v3019_v19  ;;  %726 = vmatprep.subr.bf16.mxu0 %v3020_v20  ;;  %v3072_v56 = vld [vmem:[#allocation5 + $0xa0] ss:$8 sps:$4 sm:$0xff]   ;;  %v3074_v58 = vld [vmem:[#allocation5 + $0x94] ss:$8 sps:$4 sm:$0xff]   ;;  %v3078_v60 = vld [vmem:[#allocation5 + $0x90] ss:$8 sps:$4 sm:$0xff]   ;;  %v366_v20 = vlaneseq }
  0xe1   :  { %769 = vmatprep.subr.bf16.mxu1 %v3022_v21  ;;  %v3073_v57 = vld [vmem:[#allocation5 + $0x1a0] ss:$8 sps:$4 sm:$0xff]   ;;  %v3076_v59 = vld [vmem:[#allocation5 + $0x194] ss:$8 sps:$4 sm:$0xff]   ;;  %v3079_v61 = vld [vmem:[#allocation5 + $0x190] ss:$8 sps:$4 sm:$0xff]  }
  0xe2   :  { %v3080_v62 = vld [vmem:[#allocation5 + $0x84] ss:$8 sps:$4 sm:$0xff]   ;;  %v3084_v0 = vld [vmem:[#allocation5 + $0x80] ss:$8 sps:$4 sm:$0xff]   ;;  %v3094_v6 = vld [vmem:[#allocation10 + $0x70] sm:$0xff]   ;;  %v3867_v21 = vshrl.u32 %v366_v20, 7 }
  0xe3   :  { %727 = vmatpush1.bf16.msra.mxu0 %v3024_v22  ;;  %v3082_v63 = vld [vmem:[#allocation5 + $0x184] ss:$8 sps:$4 sm:$0xff]   ;;  %v3085_v1 = vld [vmem:[#allocation5 + $0x180] ss:$8 sps:$4 sm:$0xff]   ;;  %v3095_v7 = vld [vmem:[#allocation10 + $0x30] sm:$0xff]   ;;  %vm3661_vm0 = vmmov 0  }
  0xe4   :  { %770 = vmatpush1.bf16.msra.mxu1 %v3025_v23  ;;  %728 = vmatprep.subr.bf16.mxu0 %v3026_v24  ;;  %v3086_v2 = vld [vmem:[#allocation2] ss:$16 sps:$4 sm:$0xff]   ;;  %v3089_v3 = vld [vmem:[#allocation2 + $0x8] ss:$16 sps:$4 sm:$0xff]   ;;  %v3870_v22 = vsub.s32 0, %v3867_v21  ;;  %v3874_v24 = vsub.s32 1, %v3867_v21 }
  0xe5   :  { %771 = vmatprep.subr.bf16.mxu1 %v3028_v25  ;;  %v3092_v4 = vld [vmem:[#allocation10 + $0x78] sm:$0xff]   ;;  %v3096_v8 = vld [vmem:[#allocation10 + $0x68] sm:$0xff]   ;;  %v3098_v10 = vld [vmem:[#allocation10 + $0x60] sm:$0xff]   ;;  %s4029_s19 = sld [smem:[#allocation37_spill]]  ;;  %s3663_s5 = smov [#allocation24]  }
  0xe6   :  { %v3093_v5 = vld [vmem:[#allocation10 + $0x38] sm:$0xff]   ;;  %v3097_v9 = vld [vmem:[#allocation10 + $0x28] sm:$0xff]   ;;  %v3099_v11 = vld [vmem:[#allocation10 + $0x20] sm:$0xff]   ;;  %s4030_s30 = sld [smem:[#allocation38_spill]]  ;;  %s2542_s29 = sshll.u32 %s3663_s5, 4  ;;  %s2543_s29 = int_to_ptr.vmem [resolvable:$true] %s2542_s29 }
  0xe7   :  { %729 = vmatpush1.bf16.msra.mxu0 %v3030_v26  ;;  %v3100_v12 = vld [vmem:[#allocation10 + $0x58] sm:$0xff]   ;;  %v3102_v14 = vld [vmem:[#allocation10 + $0x50] sm:$0xff]   ;;  %v3104_v16 = vld [vmem:[#allocation10 + $0x48] sm:$0xff]   ;;  %s4031_s6 = sld [smem:[#allocation39_spill]]  ;;  %s3552_s26 = scalar_lea.vmem %s2543_s29, 256 }
  0xe8   :  { %772 = vmatpush1.bf16.msra.mxu1 %v3031_v27  ;;  %730 = vmatprep.subr.bf16.mxu0 %v3032_v28  ;;  %v3101_v13 = vld [vmem:[#allocation10 + $0x18] sm:$0xff]   ;;  %v3103_v15 = vld [vmem:[#allocation10 + $0x10] sm:$0xff]   ;;  %v3105_v17 = vld [vmem:[#allocation10 + $0x8] sm:$0xff]   ;;  %s4032_s21 = sld [smem:[#allocation40_spill]]  ;;  %p3553_p9 = scmp.ne.s32.totalorder %s2543_s29, %s3552_s26 }
  0xe9   :  { %773 = vmatprep.subr.bf16.mxu1 %v3034_v29  ;;  %v3106_v18 = vld [vmem:[#allocation10 + $0x40] sm:$0xff]   ;;  %v364_v23 = vld [vmem:[%s3685_s13] sm:$0x3]  ;;  %s4027_s13 = sld [smem:[#allocation35_spill]]  ;;  %p3557_p10 = scmp.lt.s32.totalorder %s2543_s29, %s2543_s29 }
  0xea   :  { %v3107_v19 = vld [vmem:[#allocation10] sm:$0xff]   ;;  %v369_v25 = vrot.slane %v364_v23, %v3870_v22  ;;  %v373_v26 = vrot.slane %v364_v23, %v3874_v24  ;;  %s4033_s23 = sld [smem:[#allocation41_spill]]  ;;  %p3558_p11 = scmp.lt.s32.totalorder %s3552_s26, %s3552_s26 }
  0xeb   :  { %731 = vmatpush1.bf16.msra.mxu0 %v3036_v30  ;;  %s4034_s20 = sld [smem:[#allocation42_spill]] }
  0xec   :  { %774 = vmatpush1.bf16.msra.mxu1 %v3037_v31  ;;  %732 = vmatprep.subr.bf16.mxu0 %v3038_v32  ;;  %s4035_s10 = sld [smem:[#allocation43_spill]]  ;;  %p3559_p12 = por %p3558_p11, %p3557_p10 }
  0xed   :  { %775 = vmatprep.subr.bf16.mxu1 %v3040_v33  ;;  %s4036_s15 = sld [smem:[#allocation44_spill]] }
  0xee   :  { %s4037_s24 = sld [smem:[#allocation45_spill]]  ;;  %p3560_p13 = pnand %p3559_p12, %p3553_p9 }
  0xef   :  { %733 = vmatpush2.bf16.msra.mxu0 %v3042_v34  ;;  %s4038_s16 = sld [smem:[#allocation46_spill]] }
  0xf0   :  { %776 = vmatpush2.bf16.msra.mxu1 %v3043_v35  ;;  %734 = vmatprep.subr.bf16.mxu0 %v3044_v36  ;;  %s4039_s18 = sld [smem:[#allocation47_spill]] }
  0xf1   :  { %777 = vmatprep.subr.bf16.mxu1 %v3046_v37 }
  0xf3   :  { %735 = vmatpush2.bf16.msra.mxu0 %v3048_v38 }
  0xf4   :  { %778 = vmatpush2.bf16.msra.mxu1 %v3049_v39  ;;  %736 = vmatprep.subr.bf16.mxu0 %v3050_v40 }
  0xf5   :  { %779 = vmatprep.subr.bf16.mxu1 %v3052_v41 }
  0xf7   :  { %737 = vmatpush2.bf16.msra.mxu0 %v3054_v42 }
  0xf8   :  { %780 = vmatpush2.bf16.msra.mxu1 %v3055_v43  ;;  %738 = vmatprep.subr.bf16.mxu0 %v3056_v44 }
  0xf9   :  { %781 = vmatprep.subr.bf16.mxu1 %v3058_v45 }
  0xfb   :  { %739 = vmatpush2.bf16.msra.mxu0 %v3060_v46 }
  0xfc   :  { %782 = vmatpush2.bf16.msra.mxu1 %v3061_v47  ;;  %740 = vmatprep.subr.bf16.mxu0 %v3062_v49 }
  0xfd   :  { %783 = vmatprep.subr.bf16.mxu1 %v3064_v50 }
  0xff   :  { %741 = vmatpush2.bf16.msra.mxu0 %v3066_v52 }
 0x100   :  { %784 = vmatpush2.bf16.msra.mxu1 %v3067_v53  ;;  %742 = vmatprep.subr.bf16.mxu0 %v3068_v54 }
 0x101   :  { %785 = vmatprep.subr.bf16.mxu1 %v3070_v55 }
 0x103   :  { %743 = vmatpush2.bf16.msra.mxu0 %v3072_v56 }
 0x104   :  { %786 = vmatpush2.bf16.msra.mxu1 %v3073_v57  ;;  %744 = vmatprep.subr.bf16.mxu0 %v3074_v58 }
 0x105   :  { %787 = vmatprep.subr.bf16.mxu1 %v3076_v59 }
 0x107   :  { %745 = vmatpush2.bf16.msra.mxu0 %v3078_v60 }
 0x108   :  { %788 = vmatpush2.bf16.msra.mxu1 %v3079_v61  ;;  %746 = vmatprep.subr.bf16.mxu0 %v3080_v62 }
 0x109   :  { %789 = vmatprep.subr.bf16.mxu1 %v3082_v63 }
 0x10b   :  { %747 = vmatpush2.bf16.msra.mxu0 %v3084_v0 }
 0x10c   :  { %790 = vmatpush2.bf16.msra.mxu1 %v3085_v1  ;;  %2795 = vmatprep.subr.bf16.mxu0 %v3092_v4 }
 0x10e   :  { %749 = vmatmul.mubr.bf16.vlgmr.msra.gmra.mxu0 %v3086_v2 }
 0x10f   :  { %792 = vmatmul.mubr.bf16.vlgmr.msra.gmra.mxu1 %v3089_v3  ;;  %2796 = vmatpush3.bf16.msra.mxu0 %v3093_v5 }
 0x110   :  { %2797 = vmatprep.subr.bf16.mxu0 %v3094_v6 }
 0x113   :  { %2798 = vmatpush3.bf16.msra.mxu0 %v3095_v7 }
 0x114   :  { %2799 = vmatprep.subr.bf16.mxu0 %v3096_v8 }
 0x117   :  { %2800 = vmatpush3.bf16.msra.mxu0 %v3097_v9 }
 0x118   :  { %2801 = vmatprep.subr.bf16.mxu0 %v3098_v10 }
 0x11b   :  { %2802 = vmatpush3.bf16.msra.mxu0 %v3099_v11 }
 0x11c   :  { %2803 = vmatprep.subr.bf16.mxu0 %v3100_v12 }
 0x11f   :  { %2804 = vmatpush3.bf16.msra.mxu0 %v3101_v13 }
 0x120   :  { %2805 = vmatprep.subr.bf16.mxu0 %v3102_v14 }
 0x123   :  { %2806 = vmatpush3.bf16.msra.mxu0 %v3103_v15 }
 0x124   :  { %2807 = vmatprep.subr.bf16.mxu0 %v3104_v16 }
 0x127   :  { %2808 = vmatpush3.bf16.msra.mxu0 %v3105_v17 }
 0x128   :  { %2809 = vmatprep.subr.bf16.mxu0 %v3106_v18 }
 0x12b   :  { %2810 = vmatpush3.bf16.msra.mxu0 %v3107_v19 }
 0x1ce   :  { %v750_v27 = vpop.f32.mrf.mxu0 }
 0x1cf   :  { %v793_v28 = vpop.f32.mrf.mxu1  ;;  %v751_v29 = vadd.f32 %v750_v27, %v369_v25 }
 0x1d0   :  { %v752_v30 = vpop.f32.mrf.mxu0 }
 0x1d1   :  { %v795_v31 = vpop.f32.mrf.mxu1  ;;  %v794_v32 = vadd.f32 %v793_v28, %v751_v29  ;;  %v753_v33 = vadd.f32 %v752_v30, %v373_v26  ;;  %v3659_v30 = vmov 1966171168  }
 0x1d2   :  { %v754_v34 = vpop.f32.mrf.mxu0 }
 0x1d3   :  { %v797_v35 = vpop.f32.mrf.mxu1  ;;  %v796_v36 = vadd.f32 %v795_v31, %v753_v33  ;;  %v755_v37 = vadd.f32 %v754_v34, %v369_v25  ;;  %v3878_v39 = vmax.f32 %v794_v32, 0.0  ;;  %v858_v31 = vunpack.c.l.s4 %v3659_v30 }
 0x1d4   :  { %v756_v38 = vpop.f32.mrf.mxu0 }
 0x1d5   :  { %v798_v40 = vadd.f32 %v797_v35, %v755_v37  ;;  %v757_v41 = vadd.f32 %v756_v38, %v373_v26  ;;  %v3880_v42 = vmax.f32 %v796_v36, 0.0  ;;  %v799_v43 = vpop.f32.mrf.mxu1  ;;  %v823_v46 = vmul.f32 %v3878_v39, %v3878_v39  ;;  %v849_v38 = vld [vmem:[#allocation7] sm:$0x3] }
 0x1d6   :  { %v859_v32 = vunpack.c.0.s8 %v858_v31 }
 0x1d7   :  { %v3882_v44 = vmax.f32 %v798_v40, 0.0  ;;  %v800_v45 = vadd.f32 %v799_v43, %v757_v41  ;;  %v824_v50 = vmul.f32 %v3880_v42, %v3880_v42 }
 0x1d8   :  { %v3899_v34 = vsub.s32 %v859_v32, %v3867_v21 }
 0x1d9   :  { %v806_v47 = vadd.f32 %v3882_v44, %v3878_v39  ;;  %v825_v48 = vmul.f32 %v3882_v44, %v3882_v44  ;;  %v3890_v49 = vmax.f32 %v800_v45, 0.0 }
 0x1db   :  { %v807_v51 = vrot.slane %v806_v47, 4  ;;  %v827_v52 = vadd.f32 %v825_v48, %v823_v46  ;;  %v813_v53 = vadd.f32 %v3890_v49, %v3880_v42  ;;  %v826_v54 = vmul.f32 %v3890_v49, %v3890_v49 }
 0x1dd   :  { %v808_v55 = vadd.f32 %v807_v51, %v806_v47  ;;  %v828_v56 = vrot.slane %v827_v52, 4  ;;  %v814_v57 = vrot.slane %v813_v53, 4  ;;  %v834_v58 = vadd.f32 %v826_v54, %v824_v50  ;;  %v873_v51 = vld [vmem:[#allocation8] sm:$0x3] }
 0x1df   :  { %v809_v59 = vrot.slane %v808_v55, 2  ;;  %v829_v60 = vadd.f32 %v828_v56, %v827_v52  ;;  %v815_v61 = vadd.f32 %v814_v57, %v813_v53  ;;  %v835_v62 = vrot.slane %v834_v58, 4 }
 0x1e1   :  { %v810_v63 = vadd.f32 %v809_v59, %v808_v55  ;;  %v830_v0 = vrot.slane %v829_v60, 2  ;;  %v816_v1 = vrot.slane %v815_v61, 2  ;;  %v836_v2 = vadd.f32 %v835_v62, %v834_v58 }
 0x1e3   :  { %v811_v3 = vrot.slane %v810_v63, 1  ;;  %v831_v4 = vadd.f32 %v830_v0, %v829_v60  ;;  %v817_v5 = vadd.f32 %v816_v1, %v815_v61  ;;  %v837_v6 = vrot.slane %v836_v2, 2 }
 0x1e5   :  { %v812_v7 = vadd.f32 %v811_v3, %v810_v63  ;;  %v832_v8 = vrot.slane %v831_v4, 1  ;;  %v818_v9 = vrot.slane %v817_v5, 1  ;;  %v838_v10 = vadd.f32 %v837_v6, %v836_v2  ;;  %v3108_v2 = vld [vmem:[#allocation14 + $0x38] sm:$0xff]   ;;  %v3115_v6 = vld [vmem:[#allocation14] sm:$0xff]  }
 0x1e6   :  { %v3112_v3 = vld [vmem:[#allocation14 + $0x18] sm:$0xff]  }
 0x1e7   :  { %v821_v11 = vmul.f32 0.0625, %v812_v7  ;;  %v833_v12 = vadd.f32 %v832_v8, %v831_v4  ;;  %v819_v13 = vadd.f32 %v818_v9, %v817_v5  ;;  %v839_v14 = vrot.slane %v838_v10, 1  ;;  %v3113_v4 = vld [vmem:[#allocation14 + $0x10] sm:$0xff]   ;;  %v3114_v5 = vld [vmem:[#allocation14 + $0x8] sm:$0xff]   ;;  %v2662_v8 = vld [vmem:[#allocation11] ss:$0 sm:$0xff] }
 0x1e9   :  { %v841_v15 = vmul.f32 0.0625, %v833_v12  ;;  %v843_v16 = vmul.f32 %v821_v11, %v821_v11  ;;  %v822_v17 = vmul.f32 0.0625, %v819_v13  ;;  %v840_v18 = vadd.f32 %v839_v14, %v838_v10 }
 0x1eb   :  { %v845_v19 = vsub.f32 %v841_v15, %v843_v16  ;;  %v842_v20 = vmul.f32 0.0625, %v840_v18  ;;  %v844_v23 = vmul.f32 %v822_v17, %v822_v17 }
 0x1ed   :  { %v847_v25 = vmax.f32 %v845_v19, 0.0  ;;  %v846_v26 = vsub.f32 %v842_v20, %v844_v23 }
 0x1ef   :  { %v850_v27 = vadd.f32 1e-05, %v847_v25  ;;  %v848_v28 = vmax.f32 %v846_v26, 0.0 }
 0x1f1   :  { %v851_v29 = vadd.f32 1e-05, %v848_v28  ;;  %3260 = vrsqrt.f32 %v850_v27 }
 0x1f3   :  { %3262 = vrsqrt.f32 %v851_v29 }
 0x1fe   :  { %v3261_v33 = vpop.eup %3260 }
 0x200   :  { %v3263_v35 = vpop.eup %3262 }
 0x201   :  { %v856_v36 = vcombine.low %v3261_v33, %v3263_v35 }
 0x203   :  { %v863_v37 = vrot.slane %v856_v36, %v3899_v34 }
 0x205   :  { %v870_v40 = vrot.slane %v863_v37, %v3899_v34 }
 0x207   :  { %v872_v41 = vmul.f32 %v870_v40, %v849_v38 }
 0x209   :  { %v878_v43 = vrot.slane %v872_v41, %v3870_v22  ;;  %v882_v45 = vrot.slane %v872_v41, %v3874_v24 }
 0x20b   :  { %v886_v46 = vmul.f32 %v882_v45, %v822_v17  ;;  %v885_v47 = vmul.f32 %v878_v43, %v821_v11  ;;  %v909_v54 = vmul.f32 %v882_v45, %v3890_v49  ;;  %v907_v55 = vmul.f32 %v882_v45, %v3880_v42  ;;  %v3110_v42 = vld [vmem:[#allocation14 + $0x28] sm:$0xff]  }
 0x20c   :  { %v906_v57 = vmul.f32 %v878_v43, %v3878_v39  ;;  %v908_v58 = vmul.f32 %v878_v43, %v3882_v44  ;;  %v3660_v49 = vmov 0.0   ;;  %v3109_v39 = vld [vmem:[#allocation14 + $0x30] sm:$0xff]   ;;  %v3111_v44 = vld [vmem:[#allocation14 + $0x20] sm:$0xff]  }
 0x20d   :  { %v889_v48 = vcombine.low %v885_v47, %v886_v46  ;;  %2853 = vmatprep.subr.bf16.mxu1 %v3660_v49  ;;  %2873 = vmatprep.subr.bf16.mxu0 %v3660_v49  ;;  %v1126_v47 = vld [vmem:[#allocation13] sm:$0x1] }
 0x20e   :  { %2854 = vmatpush3.bf16.msra.mxu1 %v3108_v2  ;;  %2869 = vmatprep.mubr.msk.bf16.mxu1 %vm3661_vm0, %v3660_v49  ;;  %v3121_v2 = vld [vmem:[#allocation16 + $0x10] sm:$0xff]  }
 0x20f   :  { %v896_v50 = vrot.slane %v889_v48, %v3899_v34  ;;  %2855 = vmatprep.subr.bf16.mxu1 %v3660_v49 }
 0x211   :  { %v903_v52 = vrot.slane %v896_v50, %v3899_v34 }
 0x212   :  { %2856 = vmatpush3.bf16.msra.mxu1 %v3109_v39  ;;  %v3122_v39 = vld [vmem:[#allocation16 + $0x8] sm:$0xff]  }
 0x213   :  { %v905_v53 = vsub.f32 %v873_v51, %v903_v52  ;;  %2857 = vmatprep.subr.bf16.mxu1 %v3660_v49  ;;  %v1130_v51 = vld [vmem:[%s3715_s8] sm:$0x1]  ;;  %s4028_s8 = sld [smem:[#allocation36_spill]] }
 0x215   :  { %v918_v56 = vrot.slane %v905_v53, %v3874_v24  ;;  %v914_v59 = vrot.slane %v905_v53, %v3870_v22 }
 0x216   :  { %2858 = vmatpush3.bf16.msra.mxu1 %v3110_v42  ;;  %v3123_v42 = vld [vmem:[#allocation16] sm:$0xff]  }
 0x217   :  { %v922_v60 = vadd.f32 %v918_v56, %v907_v55  ;;  %v924_v61 = vadd.f32 %v918_v56, %v909_v54  ;;  %v921_v62 = vadd.f32 %v914_v59, %v906_v57  ;;  %v923_v63 = vadd.f32 %v914_v59, %v908_v58  ;;  %2859 = vmatprep.subr.bf16.mxu1 %v3660_v49 }
 0x219   :  { %v926_v0 = vpack.c.bf16 %v924_v61, %v922_v60  ;;  %v925_v1 = vpack.c.bf16 %v923_v63, %v921_v62  ;;  %v3116_v61 = vld [vmem:[#allocation16 + $0x38] sm:$0xff]   ;;  %v3117_v62 = vld [vmem:[#allocation16 + $0x30] sm:$0xff]   ;;  %v3118_v63 = vld [vmem:[#allocation16 + $0x28] sm:$0xff]  }
 0x21a   :  { %2860 = vmatpush3.bf16.msra.mxu1 %v3111_v44  ;;  %v3124_v44 = vld [vmem:[#allocation17 + $0x38] sm:$0xff]  }
 0x21b   :  { %1094 = vmatprep.mubr.bf16.mxu0 %v926_v0  ;;  %2861 = vmatprep.subr.bf16.mxu1 %v3660_v49  ;;  %v3119_v0 = vld [vmem:[#allocation16 + $0x20] sm:$0xff]  }
 0x21c   :  { %1095 = vmatmul.mubr.bf16.vlgmr.msra.gmra.mxu0 %v925_v1  ;;  %v3120_v1 = vld [vmem:[#allocation16 + $0x18] sm:$0xff]  }
 0x21d   :  { %2889 = vmatprep.mubr.msk.bf16.mxu0 %vm3661_vm0, %v3660_v49  ;;  %2874 = vmatpush3.bf16.msra.mxu0 %v3116_v61  ;;  %v3131_v61 = vld [vmem:[#allocation17] sm:$0xff]  }
 0x21e   :  { %2862 = vmatpush3.bf16.msra.mxu1 %v3112_v3  ;;  %2875 = vmatprep.subr.bf16.mxu0 %v3660_v49  ;;  %v3125_v3 = vld [vmem:[#allocation17 + $0x30] sm:$0xff]  }
 0x21f   :  { %2863 = vmatprep.subr.bf16.mxu1 %v3660_v49 }
 0x221   :  { %2876 = vmatpush3.bf16.msra.mxu0 %v3117_v62  ;;  %v2688_v62 = vld [vmem:[%s4030_s30] ss:$0 sm:$0xff] }
 0x222   :  { %2864 = vmatpush3.bf16.msra.mxu1 %v3113_v4  ;;  %2877 = vmatprep.subr.bf16.mxu0 %v3660_v49  ;;  %v3126_v4 = vld [vmem:[#allocation17 + $0x28] sm:$0xff]  }
 0x223   :  { %2865 = vmatprep.subr.bf16.mxu1 %v3660_v49 }
 0x225   :  { %2878 = vmatpush3.bf16.msra.mxu0 %v3118_v63 }
 0x226   :  { %2866 = vmatpush3.bf16.msra.mxu1 %v3114_v5  ;;  %2879 = vmatprep.subr.bf16.mxu0 %v3660_v49  ;;  %v3127_v5 = vld [vmem:[#allocation17 + $0x20] sm:$0xff]  }
 0x227   :  { %2867 = vmatprep.subr.bf16.mxu1 %v3660_v49 }
 0x229   :  { %2880 = vmatpush3.bf16.msra.mxu0 %v3119_v0 }
 0x22a   :  { %2868 = vmatpush3.bf16.msra.mxu1 %v3115_v6  ;;  %2881 = vmatprep.subr.bf16.mxu0 %v3660_v49  ;;  %v3128_v6 = vld [vmem:[#allocation17 + $0x18] sm:$0xff]  }
 0x22b   :  { %2893 = vmatprep.subr.bf16.mxu1 %v3660_v49 }
 0x22d   :  { %2882 = vmatpush3.bf16.msra.mxu0 %v3120_v1 }
 0x22e   :  { %2883 = vmatprep.subr.bf16.mxu0 %v3660_v49 }
 0x231   :  { %2884 = vmatpush3.bf16.msra.mxu0 %v3121_v2 }
 0x232   :  { %2885 = vmatprep.subr.bf16.mxu0 %v3660_v49 }
 0x235   :  { %2886 = vmatpush3.bf16.msra.mxu0 %v3122_v39 }
 0x236   :  { %2887 = vmatprep.subr.bf16.mxu0 %v3660_v49 }
 0x239   :  { %2888 = vmatpush3.bf16.msra.mxu0 %v3123_v42 }
 0x23a   :  { %2913 = vmatprep.subr.bf16.mxu0 %v3660_v49 }
 0x2dc   :  { %v2811_v7 = vpop.f32.mrf.mxu0 }
 0x2de   :  { %v2812_v9 = vpop.f32.mrf.mxu0 }
 0x2df   :  { %v2813_v10 = vadd.f32 %v2812_v9, %v2811_v7  ;;  %v3129_v7 = vld [vmem:[#allocation17 + $0x10] sm:$0xff]  }
 0x2e0   :  { %v2814_v11 = vpop.f32.mrf.mxu0 }
 0x2e1   :  { %v1097_v12 = vadd.f32 %v2813_v10, %v2662_v8 }
 0x2e2   :  { %v2815_v13 = vpop.f32.mrf.mxu0 }
 0x2e3   :  { %v2816_v14 = vadd.f32 %v2815_v13, %v2814_v11  ;;  %v1103_v15 = vmax.f32 %v1097_v12, 0.0 }
 0x2e5   :  { %v1100_v16 = vadd.f32 %v2816_v14, %v2662_v8  ;;  %v1113_v18 = vmul.f32 %v1103_v15, %v1103_v15  ;;  %v2679_v8 = vld [vmem:[%s4027_s13] ss:$0 sm:$0xff] }
 0x2e7   :  { %v1104_v17 = vmax.f32 %v1100_v16, 0.0 }
 0x2e9   :  { %v1105_v19 = vadd.f32 %v1104_v17, %v1103_v15  ;;  %v1114_v20 = vmul.f32 %v1104_v17, %v1104_v17 }
 0x2eb   :  { %v1106_v23 = vrot.slane %v1105_v19, 4  ;;  %v1115_v25 = vadd.f32 %v1114_v20, %v1113_v18 }
 0x2ed   :  { %v1107_v26 = vadd.f32 %v1106_v23, %v1105_v19  ;;  %v1116_v27 = vrot.slane %v1115_v25, 4 }
 0x2ef   :  { %v1108_v28 = vrot.slane %v1107_v26, 2  ;;  %v1117_v29 = vadd.f32 %v1116_v27, %v1115_v25 }
 0x2f1   :  { %v1109_v30 = vadd.f32 %v1108_v28, %v1107_v26  ;;  %v1118_v31 = vrot.slane %v1117_v29, 2 }
 0x2f3   :  { %v1110_v32 = vrot.slane %v1109_v30, 1  ;;  %v1119_v33 = vadd.f32 %v1118_v31, %v1117_v29 }
 0x2f5   :  { %v1111_v35 = vadd.f32 %v1110_v32, %v1109_v30  ;;  %v1120_v36 = vrot.slane %v1119_v33, 1 }
 0x2f7   :  { %v1112_v37 = vmul.f32 0.0625, %v1111_v35  ;;  %v1121_v38 = vadd.f32 %v1120_v36, %v1119_v33 }
 0x2f9   :  { %v1122_v40 = vmul.f32 0.0625, %v1121_v38  ;;  %v1123_v41 = vmul.f32 %v1112_v37, %v1112_v37 }
 0x2fb   :  { %v1124_v43 = vsub.f32 %v1122_v40, %v1123_v41 }
 0x2fd   :  { %v1125_v45 = vmax.f32 %v1124_v43, 0.0 }
 0x2ff   :  { %v1127_v46 = vadd.f32 1e-05, %v1125_v45 }
 0x301   :  { %3264 = vrsqrt.f32 %v1127_v46  ;;  %v1285_v46 = vld [vmem:[%s4028_s8] sm:$0x1] }
 0x30e   :  { %v3265_v48 = vpop.eup %3264 }
 0x30f   :  { %v1129_v50 = vmul.f32 %v3265_v48, %v1126_v47 }
 0x311   :  { %v1131_v52 = vmul.f32 %v1129_v50, %v1112_v37  ;;  %v1137_v53 = vrot.slane %v1129_v50, %v3870_v22  ;;  %v1289_v50 = vld [vmem:[%s4029_s19] sm:$0x1] }
 0x313   :  { %v1132_v54 = vsub.f32 %v1130_v51, %v1131_v52  ;;  %v1140_v55 = vmul.f32 %v1137_v53, %v1104_v17  ;;  %v1139_v56 = vmul.f32 %v1137_v53, %v1103_v15 }
 0x315   :  { %v1145_v57 = vrot.slane %v1132_v54, %v3870_v22 }
 0x317   :  { %v1147_v58 = vadd.f32 %v1145_v57, %v1139_v56  ;;  %v1148_v59 = vadd.f32 %v1145_v57, %v1140_v55 }
 0x319   :  { %v1149_v60 = vpack.c.bf16 %v1148_v59, %v1147_v58 }
 0x31b   :  { %2870 = vmatmul.mubr.bf16.vlgmr.msra.gmra.mxu1 %v1149_v60  ;;  %v3130_v60 = vld [vmem:[#allocation17 + $0x8] sm:$0xff]  }
 0x31c   :  { %2909 = vmatprep.mubr.msk.bf16.mxu1 %vm3661_vm0, %v3660_v49  ;;  %2894 = vmatpush3.bf16.msra.mxu1 %v3124_v44 }
 0x31d   :  { %2895 = vmatprep.subr.bf16.mxu1 %v3660_v49 }
 0x320   :  { %2896 = vmatpush3.bf16.msra.mxu1 %v3125_v3  ;;  %v3132_v3 = vld [vmem:[#allocation19 + $0x38] sm:$0xff]  }
 0x321   :  { %2897 = vmatprep.subr.bf16.mxu1 %v3660_v49 }
 0x324   :  { %2898 = vmatpush3.bf16.msra.mxu1 %v3126_v4  ;;  %v3133_v4 = vld [vmem:[#allocation19 + $0x30] sm:$0xff]  }
 0x325   :  { %2899 = vmatprep.subr.bf16.mxu1 %v3660_v49 }
 0x328   :  { %2900 = vmatpush3.bf16.msra.mxu1 %v3127_v5  ;;  %v3134_v5 = vld [vmem:[#allocation19 + $0x28] sm:$0xff]  }
 0x329   :  { %2901 = vmatprep.subr.bf16.mxu1 %v3660_v49 }
 0x32c   :  { %2902 = vmatpush3.bf16.msra.mxu1 %v3128_v6  ;;  %v3135_v6 = vld [vmem:[#allocation19 + $0x20] sm:$0xff]  }
 0x32d   :  { %2903 = vmatprep.subr.bf16.mxu1 %v3660_v49 }
 0x330   :  { %2904 = vmatpush3.bf16.msra.mxu1 %v3129_v7  ;;  %v3136_v7 = vld [vmem:[#allocation19 + $0x18] sm:$0xff]  }
 0x331   :  { %2905 = vmatprep.subr.bf16.mxu1 %v3660_v49 }
 0x334   :  { %2906 = vmatpush3.bf16.msra.mxu1 %v3130_v60 }
 0x335   :  { %2907 = vmatprep.subr.bf16.mxu1 %v3660_v49 }
 0x338   :  { %2908 = vmatpush3.bf16.msra.mxu1 %v3131_v61 }
 0x3db   :  { %v1255_v9 = vpop.f32.mrf.mxu1 }
 0x3dc   :  { %v1256_v10 = vadd.f32 %v2679_v8, %v1255_v9  ;;  %v3138_v9 = vld [vmem:[#allocation19 + $0x8] sm:$0xff]  }
 0x3dd   :  { %v2871_v11 = vpop.f32.mrf.mxu1 }
 0x3de   :  { %v1262_v13 = vmax.f32 %v1256_v10, 0.0  ;;  %v3139_v10 = vld [vmem:[#allocation19] sm:$0xff]   ;;  %v2697_v11 = vld [vmem:[%s4031_s6] ss:$0 sm:$0xff] }
 0x3df   :  { %v1258_v12 = vpop.f32.mrf.mxu1 }
 0x3e0   :  { %v1259_v14 = vadd.f32 %v2679_v8, %v1258_v12  ;;  %v1272_v17 = vmul.f32 %v1262_v13, %v1262_v13  ;;  %v3137_v8 = vld [vmem:[#allocation19 + $0x10] sm:$0xff]  }
 0x3e1   :  { %v2872_v15 = vpop.f32.mrf.mxu1 }
 0x3e2   :  { %v1263_v16 = vmax.f32 %v1259_v14, 0.0 }
 0x3e4   :  { %v1264_v18 = vadd.f32 %v1263_v16, %v1262_v13  ;;  %v1273_v19 = vmul.f32 %v1263_v16, %v1263_v16 }
 0x3e6   :  { %v1265_v20 = vrot.slane %v1264_v18, 4  ;;  %v1274_v23 = vadd.f32 %v1273_v19, %v1272_v17 }
 0x3e8   :  { %v1266_v25 = vadd.f32 %v1265_v20, %v1264_v18  ;;  %v1275_v26 = vrot.slane %v1274_v23, 4 }
 0x3ea   :  { %v1267_v27 = vrot.slane %v1266_v25, 2  ;;  %v1276_v28 = vadd.f32 %v1275_v26, %v1274_v23 }
 0x3ec   :  { %v1268_v29 = vadd.f32 %v1267_v27, %v1266_v25  ;;  %v1277_v30 = vrot.slane %v1276_v28, 2 }
 0x3ee   :  { %v1269_v31 = vrot.slane %v1268_v29, 1  ;;  %v1278_v32 = vadd.f32 %v1277_v30, %v1276_v28 }
 0x3f0   :  { %v1270_v33 = vadd.f32 %v1269_v31, %v1268_v29  ;;  %v1279_v35 = vrot.slane %v1278_v32, 1 }
 0x3f2   :  { %v1271_v36 = vmul.f32 0.0625, %v1270_v33  ;;  %v1280_v37 = vadd.f32 %v1279_v35, %v1278_v32 }
 0x3f4   :  { %v1281_v38 = vmul.f32 0.0625, %v1280_v37  ;;  %v1282_v40 = vmul.f32 %v1271_v36, %v1271_v36 }
 0x3f6   :  { %v1283_v41 = vsub.f32 %v1281_v38, %v1282_v40 }
 0x3f8   :  { %v1284_v43 = vmax.f32 %v1283_v41, 0.0 }
 0x3fa   :  { %v1286_v45 = vadd.f32 1e-05, %v1284_v43 }
 0x3fc   :  { %3266 = vrsqrt.f32 %v1286_v45 }
 0x409   :  { %v3267_v47 = vpop.eup %3266 }
 0x40a   :  { %v1288_v48 = vmul.f32 %v3267_v47, %v1285_v46 }
 0x40c   :  { %v1290_v51 = vmul.f32 %v1288_v48, %v1271_v36  ;;  %v1296_v52 = vrot.slane %v1288_v48, %v3870_v22  ;;  %v1559_v48 = vld [vmem:[%s4032_s21] sm:$0x1] }
 0x40e   :  { %v1291_v53 = vsub.f32 %v1289_v50, %v1290_v51  ;;  %v1298_v54 = vmul.f32 %v1296_v52, %v1262_v13  ;;  %v1299_v55 = vmul.f32 %v1296_v52, %v1263_v16  ;;  %v1563_v52 = vld [vmem:[%s4033_s23] sm:$0x1] }
 0x410   :  { %v1304_v56 = vrot.slane %v1291_v53, %v3870_v22 }
 0x412   :  { %v1307_v57 = vadd.f32 %v1304_v56, %v1299_v55  ;;  %v1306_v58 = vadd.f32 %v1304_v56, %v1298_v54 }
 0x414   :  { %v1308_v59 = vpack.c.bf16 %v1307_v57, %v1306_v58 }
 0x416   :  { %2890 = vmatmul.mubr.bf16.vlgmr.msra.gmra.mxu0 %v1308_v59 }
 0x417   :  { %2929 = vmatprep.mubr.msk.bf16.mxu0 %vm3661_vm0, %v3660_v49  ;;  %2914 = vmatpush3.bf16.msra.mxu0 %v3132_v3  ;;  %v3154_v3 = vld [vmem:[#allocation20 + $0x34] ss:$8 sps:$4 sm:$0xff]  }
 0x418   :  { %2915 = vmatprep.subr.bf16.mxu0 %v3660_v49 }
 0x41b   :  { %2916 = vmatpush3.bf16.msra.mxu0 %v3133_v4  ;;  %v3152_v4 = vld [vmem:[#allocation20 + $0x30] ss:$8 sps:$4 sm:$0xff]  }
 0x41c   :  { %2917 = vmatprep.subr.bf16.mxu0 %v3660_v49 }
 0x41f   :  { %2918 = vmatpush3.bf16.msra.mxu0 %v3134_v5  ;;  %v3157_v5 = vld [vmem:[#allocation20 + $0x24] ss:$8 sps:$4 sm:$0xff]  }
 0x420   :  { %2919 = vmatprep.subr.bf16.mxu0 %v3660_v49 }
 0x423   :  { %2920 = vmatpush3.bf16.msra.mxu0 %v3135_v6  ;;  %v3155_v6 = vld [vmem:[#allocation20 + $0x20] ss:$8 sps:$4 sm:$0xff]  }
 0x424   :  { %2921 = vmatprep.subr.bf16.mxu0 %v3660_v49 }
 0x427   :  { %2922 = vmatpush3.bf16.msra.mxu0 %v3136_v7  ;;  %v3160_v7 = vld [vmem:[#allocation20 + $0x14] ss:$8 sps:$4 sm:$0xff]  }
 0x428   :  { %2923 = vmatprep.subr.bf16.mxu0 %v3660_v49 }
 0x42b   :  { %2924 = vmatpush3.bf16.msra.mxu0 %v3137_v8  ;;  %v3158_v8 = vld [vmem:[#allocation20 + $0x10] ss:$8 sps:$4 sm:$0xff]  }
 0x42c   :  { %2925 = vmatprep.subr.bf16.mxu0 %v3660_v49 }
 0x42f   :  { %2926 = vmatpush3.bf16.msra.mxu0 %v3138_v9  ;;  %v3163_v9 = vld [vmem:[#allocation20 + $0x4] ss:$8 sps:$4 sm:$0xff]  }
 0x430   :  { %2927 = vmatprep.subr.bf16.mxu0 %v3660_v49 }
 0x433   :  { %2928 = vmatpush3.bf16.msra.mxu0 %v3139_v10  ;;  %v3161_v10 = vld [vmem:[#allocation20] ss:$8 sps:$4 sm:$0xff]  }
 0x4d6   :  { %v1414_v63 = vpop.f32.mrf.mxu0 }
 0x4d7   :  { %v1415_v0 = vadd.f32 %v2688_v62, %v1414_v63  ;;  %v3140_v63 = vld [vmem:[#allocation20 + $0x70] ss:$8 sps:$4 sm:$0xff]  }
 0x4d8   :  { %v2891_v1 = vpop.f32.mrf.mxu0 }
 0x4d9   :  { %1421 = vst [vmem:[#allocation24] sm:$0xff] %v1415_v0  ;;  %v3143_v1 = vld [vmem:[#allocation20 + $0x60] ss:$8 sps:$4 sm:$0xff]  }
 0x4da   :  { %v1417_v2 = vpop.f32.mrf.mxu0 }
 0x4db   :  { %v1418_v39 = vadd.f32 %v2688_v62, %v1417_v2  ;;  %v3142_v62 = vld [vmem:[#allocation20 + $0x74] ss:$8 sps:$4 sm:$0xff]  }
 0x4dc   :  { %v2892_v42 = vpop.f32.mrf.mxu0  ;;  %1850 = vmatprep.subr.bf16.mxu1 %v3142_v62  ;;  %v3148_v2 = vld [vmem:[#allocation20 + $0x54] ss:$8 sps:$4 sm:$0xff]  }
 0x4dd   :  { %1422 = vst [vmem:[#allocation24 + $0x8] sm:$0xff] %v1418_v39  ;;  %v1423_v44 = vpack.c.bf16 %v1418_v39, %v1415_v0  ;;  %v3145_v0 = vld [vmem:[#allocation20 + $0x64] ss:$8 sps:$4 sm:$0xff]   ;;  %v3146_v39 = vld [vmem:[#allocation20 + $0x50] ss:$8 sps:$4 sm:$0xff]  }
 0x4de   :  { %v3151_v42 = vld [vmem:[#allocation20 + $0x44] ss:$8 sps:$4 sm:$0xff]  }
 0x4df   :  { %2910 = vmatmul.mubr.bf16.vlgmr.msra.gmra.mxu1 %v1423_v44  ;;  %v3149_v44 = vld [vmem:[#allocation20 + $0x40] ss:$8 sps:$4 sm:$0xff]  }
 0x4e0   :  { %1851 = vmatpush1.bf16.msra.mxu1 %v3140_v63  ;;  %v3166_v63 = vld [vmem:[#allocation22 + $0xe4] ss:$16 sps:$4 sm:$0xff]  }
 0x4e1   :  { %1852 = vmatprep.subr.bf16.mxu1 %v3145_v0  ;;  %v3169_v0 = vld [vmem:[#allocation22 + $0xec] ss:$16 sps:$4 sm:$0xff]   ;;  %2423 = vmatprep.subr.bf16.mxu0 %v3166_v63  ;;  %v3256_v63 = vld [vmem:[#allocation22 + $0x104] ss:$16 sps:$4 sm:$0xff]  }
 0x4e4   :  { %1853 = vmatpush1.bf16.msra.mxu1 %v3143_v1  ;;  %v3164_v1 = vld [vmem:[#allocation22 + $0xe0] ss:$16 sps:$4 sm:$0xff]  }
 0x4e5   :  { %1854 = vmatprep.subr.bf16.mxu1 %v3148_v2  ;;  %v3167_v2 = vld [vmem:[#allocation22 + $0xe8] ss:$16 sps:$4 sm:$0xff]  }
 0x4e8   :  { %1855 = vmatpush1.bf16.msra.mxu1 %v3146_v39  ;;  %v3172_v39 = vld [vmem:[#allocation22 + $0xc4] ss:$16 sps:$4 sm:$0xff]  }
 0x4e9   :  { %1856 = vmatprep.subr.bf16.mxu1 %v3151_v42  ;;  %v3175_v42 = vld [vmem:[#allocation22 + $0xcc] ss:$16 sps:$4 sm:$0xff]  }
 0x4ec   :  { %1857 = vmatpush1.bf16.msra.mxu1 %v3149_v44  ;;  %v3170_v44 = vld [vmem:[#allocation22 + $0xc0] ss:$16 sps:$4 sm:$0xff]  }
 0x4ed   :  { %1858 = vmatprep.subr.bf16.mxu1 %v3154_v3  ;;  %v3173_v3 = vld [vmem:[#allocation22 + $0xc8] ss:$16 sps:$4 sm:$0xff]  }
 0x4f0   :  { %1859 = vmatpush1.bf16.msra.mxu1 %v3152_v4  ;;  %v3178_v4 = vld [vmem:[#allocation22 + $0xa4] ss:$16 sps:$4 sm:$0xff]  }
 0x4f1   :  { %1860 = vmatprep.subr.bf16.mxu1 %v3157_v5  ;;  %v3181_v5 = vld [vmem:[#allocation22 + $0xac] ss:$16 sps:$4 sm:$0xff]  }
 0x4f4   :  { %1861 = vmatpush1.bf16.msra.mxu1 %v3155_v6  ;;  %v3176_v6 = vld [vmem:[#allocation22 + $0xa0] ss:$16 sps:$4 sm:$0xff]  }
 0x4f5   :  { %1862 = vmatprep.subr.bf16.mxu1 %v3160_v7  ;;  %v3179_v7 = vld [vmem:[#allocation22 + $0xa8] ss:$16 sps:$4 sm:$0xff]  }
 0x4f8   :  { %1863 = vmatpush1.bf16.msra.mxu1 %v3158_v8  ;;  %v3184_v8 = vld [vmem:[#allocation22 + $0x84] ss:$16 sps:$4 sm:$0xff]  }
 0x4f9   :  { %1864 = vmatprep.subr.bf16.mxu1 %v3163_v9  ;;  %v3187_v9 = vld [vmem:[#allocation22 + $0x8c] ss:$16 sps:$4 sm:$0xff]  }
 0x4fc   :  { %1865 = vmatpush1.bf16.msra.mxu1 %v3161_v10  ;;  %v3182_v10 = vld [vmem:[#allocation22 + $0x80] ss:$16 sps:$4 sm:$0xff]  }
 0x4fd   :  { %2466 = vmatprep.subr.bf16.mxu1 %v3169_v0  ;;  %v3259_v0 = vld [vmem:[#allocation22 + $0x10c] ss:$16 sps:$4 sm:$0xff]  }
 0x59f   :  { %v1529_v12 = vpop.f32.mrf.mxu1 }
 0x5a0   :  { %v1530_v13 = vadd.f32 %v2697_v11, %v1529_v12  ;;  %v2706_v12 = vld [vmem:[%s4034_s20] ss:$0 sm:$0xff] }
 0x5a1   :  { %v2911_v14 = vpop.f32.mrf.mxu1 }
 0x5a2   :  { %v1536_v16 = vmax.f32 %v1530_v13, 0.0 }
 0x5a3   :  { %v1532_v15 = vpop.f32.mrf.mxu1 }
 0x5a4   :  { %v1533_v17 = vadd.f32 %v2697_v11, %v1532_v15  ;;  %v1546_v20 = vmul.f32 %v1536_v16, %v1536_v16  ;;  %v3662_v11 = vmov 0  }
 0x5a5   :  { %v2912_v18 = vpop.f32.mrf.mxu1  ;;  %1882 = vmatprep.mubr.bf16.mxu1 %v3662_v11  ;;  %v3185_v11 = vld [vmem:[#allocation22 + $0x88] ss:$16 sps:$4 sm:$0xff]  }
 0x5a6   :  { %v1537_v19 = vmax.f32 %v1533_v17, 0.0 }
 0x5a8   :  { %v1538_v23 = vadd.f32 %v1537_v19, %v1536_v16  ;;  %v1547_v25 = vmul.f32 %v1537_v19, %v1537_v19 }
 0x5aa   :  { %v1539_v26 = vrot.slane %v1538_v23, 4  ;;  %v1548_v27 = vadd.f32 %v1547_v25, %v1546_v20 }
 0x5ac   :  { %v1540_v28 = vadd.f32 %v1539_v26, %v1538_v23  ;;  %v1549_v29 = vrot.slane %v1548_v27, 4 }
 0x5ae   :  { %v1541_v30 = vrot.slane %v1540_v28, 2  ;;  %v1550_v49 = vadd.f32 %v1549_v29, %v1548_v27 }
 0x5b0   :  { %v1542_v31 = vadd.f32 %v1541_v30, %v1540_v28  ;;  %v1551_v32 = vrot.slane %v1550_v49, 2 }
 0x5b2   :  { %v1543_v33 = vrot.slane %v1542_v31, 1  ;;  %v1552_v35 = vadd.f32 %v1551_v32, %v1550_v49 }
 0x5b4   :  { %v1544_v36 = vadd.f32 %v1543_v33, %v1542_v31  ;;  %v1553_v37 = vrot.slane %v1552_v35, 1 }
 0x5b6   :  { %v1545_v38 = vmul.f32 0.0625, %v1544_v36  ;;  %v1554_v40 = vadd.f32 %v1553_v37, %v1552_v35 }
 0x5b8   :  { %v1555_v41 = vmul.f32 0.0625, %v1554_v40  ;;  %v1556_v43 = vmul.f32 %v1545_v38, %v1545_v38 }
 0x5ba   :  { %v1557_v45 = vsub.f32 %v1555_v41, %v1556_v43 }
 0x5bc   :  { %v1558_v46 = vmax.f32 %v1557_v45, 0.0 }
 0x5be   :  { %v1560_v47 = vadd.f32 1e-05, %v1558_v46 }
 0x5c0   :  { %3268 = vrsqrt.f32 %v1560_v47 }
 0x5cd   :  { %v3269_v50 = vpop.eup %3268 }
 0x5ce   :  { %v1562_v51 = vmul.f32 %v3269_v50, %v1559_v48  ;;  %v1718_v50 = vld [vmem:[%s4035_s10] sm:$0x1] }
 0x5d0   :  { %v1564_v53 = vmul.f32 %v1562_v51, %v1545_v38  ;;  %v1570_v54 = vrot.slane %v1562_v51, %v3870_v22 }
 0x5d2   :  { %v1565_v55 = vsub.f32 %v1563_v52, %v1564_v53  ;;  %v1572_v56 = vmul.f32 %v1570_v54, %v1536_v16  ;;  %v1573_v57 = vmul.f32 %v1570_v54, %v1537_v19  ;;  %v1722_v53 = vld [vmem:[%s4036_s15] sm:$0x1] }
 0x5d4   :  { %v1578_v58 = vrot.slane %v1565_v55, %v3870_v22 }
 0x5d6   :  { %v1581_v59 = vadd.f32 %v1578_v58, %v1573_v57  ;;  %v1580_v60 = vadd.f32 %v1578_v58, %v1572_v56 }
 0x5d8   :  { %v1582_v61 = vpack.c.bf16 %v1581_v59, %v1580_v60 }
 0x5da   :  { %2930 = vmatmul.mubr.bf16.vlgmr.msra.gmra.mxu0 %v1582_v61 }
 0x5db   :  { %2424 = vmatpush1.bf16.msra.mxu0 %v3164_v1  ;;  %v3254_v1 = vld [vmem:[#allocation22 + $0x100] ss:$16 sps:$4 sm:$0xff]  }
 0x5dc   :  { %2425 = vmatprep.subr.bf16.mxu0 %v3172_v39  ;;  %v1758_v39 = vld [vmem:[%s4037_s24] sm:$0x3] }
 0x5df   :  { %2426 = vmatpush1.bf16.msra.mxu0 %v3170_v44  ;;  %v1767_v44 = vrot.slane %v1758_v39, %v3874_v24 }
 0x5e0   :  { %2427 = vmatprep.subr.bf16.mxu0 %v3178_v4 }
 0x5e3   :  { %2428 = vmatpush1.bf16.msra.mxu0 %v3176_v6 }
 0x5e4   :  { %2429 = vmatprep.subr.bf16.mxu0 %v3184_v8 }
 0x5e7   :  { %2430 = vmatpush1.bf16.msra.mxu0 %v3182_v10 }
 0x69a   :  { %v1688_v13 = vpop.f32.mrf.mxu0 }
 0x69b   :  { %v1689_v14 = vadd.f32 %v2706_v12, %v1688_v13  ;;  %v3193_v13 = vld [vmem:[#allocation22 + $0x6c] ss:$16 sps:$4 sm:$0xff]  }
 0x69c   :  { %v2931_v15 = vpop.f32.mrf.mxu0 }
 0x69d   :  { %v1695_v17 = vmax.f32 %v1689_v14, 0.0  ;;  %v3188_v14 = vld [vmem:[#allocation22 + $0x60] ss:$16 sps:$4 sm:$0xff]   ;;  %v3191_v15 = vld [vmem:[#allocation22 + $0x68] ss:$16 sps:$4 sm:$0xff]  }
 0x69e   :  { %v1691_v16 = vpop.f32.mrf.mxu0 }
 0x69f   :  { %v1692_v18 = vadd.f32 %v2706_v12, %v1691_v16  ;;  %v1705_v23 = vmul.f32 %v1695_v17, %v1695_v17  ;;  %v3190_v12 = vld [vmem:[#allocation22 + $0x64] ss:$16 sps:$4 sm:$0xff]  }
 0x6a0   :  { %v2932_v19 = vpop.f32.mrf.mxu0  ;;  %2431 = vmatprep.subr.bf16.mxu0 %v3190_v12  ;;  %v3196_v16 = vld [vmem:[#allocation22 + $0x44] ss:$16 sps:$4 sm:$0xff]  }
 0x6a1   :  { %v1696_v20 = vmax.f32 %v1692_v18, 0.0  ;;  %2432 = vmatpush1.bf16.msra.mxu0 %v3188_v14  ;;  %v3194_v18 = vld [vmem:[#allocation22 + $0x40] ss:$16 sps:$4 sm:$0xff]   ;;  %v3197_v19 = vld [vmem:[#allocation22 + $0x48] ss:$16 sps:$4 sm:$0xff]  }
 0x6a2   :  { %2433 = vmatprep.subr.bf16.mxu0 %v3196_v16 }
 0x6a3   :  { %v1697_v25 = vadd.f32 %v1696_v20, %v1695_v17  ;;  %v1706_v26 = vmul.f32 %v1696_v20, %v1696_v20 }
 0x6a5   :  { %v1698_v27 = vrot.slane %v1697_v25, 4  ;;  %v1707_v28 = vadd.f32 %v1706_v26, %v1705_v23  ;;  %2434 = vmatpush1.bf16.msra.mxu0 %v3194_v18  ;;  %v3205_v23 = vld [vmem:[#allocation22 + $0x2c] ss:$16 sps:$4 sm:$0xff]   ;;  %v3203_v26 = vld [vmem:[#allocation22 + $0x28] ss:$16 sps:$4 sm:$0xff]  }
 0x6a7   :  { %v1699_v29 = vadd.f32 %v1698_v27, %v1697_v25  ;;  %v1708_v30 = vrot.slane %v1707_v28, 4  ;;  %v3200_v25 = vld [vmem:[#allocation22 + $0x20] ss:$16 sps:$4 sm:$0xff]   ;;  %v3208_v27 = vld [vmem:[#allocation22 + $0x4] ss:$16 sps:$4 sm:$0xff]  }
 0x6a9   :  { %v1700_v49 = vrot.slane %v1699_v29, 2  ;;  %v1709_v31 = vadd.f32 %v1708_v30, %v1707_v28  ;;  %v3211_v28 = vld [vmem:[#allocation22 + $0xc] ss:$16 sps:$4 sm:$0xff]   ;;  %v3209_v30 = vld [vmem:[#allocation22 + $0x8] ss:$16 sps:$4 sm:$0xff]  }
 0x6ab   :  { %v1701_v32 = vadd.f32 %v1700_v49, %v1699_v29  ;;  %v1710_v33 = vrot.slane %v1709_v31, 2  ;;  %v3206_v29 = vld [vmem:[#allocation22] ss:$16 sps:$4 sm:$0xff]   ;;  %v3214_v49 = vld [vmem:[#allocation22 + $0x1e4] ss:$16 sps:$4 sm:$0xff]  }
 0x6ad   :  { %v1702_v35 = vrot.slane %v1701_v32, 1  ;;  %v1711_v36 = vadd.f32 %v1710_v33, %v1709_v31  ;;  %v3217_v31 = vld [vmem:[#allocation22 + $0x1ec] ss:$16 sps:$4 sm:$0xff]   ;;  %v3215_v33 = vld [vmem:[#allocation22 + $0x1e8] ss:$16 sps:$4 sm:$0xff]  }
 0x6af   :  { %v1703_v37 = vadd.f32 %v1702_v35, %v1701_v32  ;;  %v1712_v38 = vrot.slane %v1711_v36, 1  ;;  %v3212_v32 = vld [vmem:[#allocation22 + $0x1e0] ss:$16 sps:$4 sm:$0xff]   ;;  %v3220_v35 = vld [vmem:[#allocation22 + $0x1c4] ss:$16 sps:$4 sm:$0xff]  }
 0x6b1   :  { %v1704_v40 = vmul.f32 0.0625, %v1703_v37  ;;  %v1713_v41 = vadd.f32 %v1712_v38, %v1711_v36  ;;  %v3223_v36 = vld [vmem:[#allocation22 + $0x1cc] ss:$16 sps:$4 sm:$0xff]   ;;  %v3218_v37 = vld [vmem:[#allocation22 + $0x1c0] ss:$16 sps:$4 sm:$0xff]  }
 0x6b2   :  { %v3221_v38 = vld [vmem:[#allocation22 + $0x1c8] ss:$16 sps:$4 sm:$0xff]  }
 0x6b3   :  { %v1714_v43 = vmul.f32 0.0625, %v1713_v41  ;;  %v1715_v45 = vmul.f32 %v1704_v40, %v1704_v40  ;;  %v3229_v41 = vld [vmem:[#allocation22 + $0x1ac] ss:$16 sps:$4 sm:$0xff]  }
 0x6b5   :  { %v1716_v46 = vsub.f32 %v1714_v43, %v1715_v45  ;;  %v3224_v43 = vld [vmem:[#allocation22 + $0x1a0] ss:$16 sps:$4 sm:$0xff]   ;;  %v3227_v45 = vld [vmem:[#allocation22 + $0x1a8] ss:$16 sps:$4 sm:$0xff]  }
 0x6b7   :  { %v1717_v47 = vmax.f32 %v1716_v46, 0.0  ;;  %v3232_v46 = vld [vmem:[#allocation22 + $0x184] ss:$16 sps:$4 sm:$0xff]  }
 0x6b9   :  { %v1719_v48 = vadd.f32 1e-05, %v1717_v47  ;;  %v3235_v47 = vld [vmem:[#allocation22 + $0x18c] ss:$16 sps:$4 sm:$0xff]  }
 0x6bb   :  { %3270 = vrsqrt.f32 %v1719_v48  ;;  %v3230_v48 = vld [vmem:[#allocation22 + $0x180] ss:$16 sps:$4 sm:$0xff]  }
 0x6c8   :  { %v3271_v51 = vpop.eup %3270 }
 0x6c9   :  { %v1721_v52 = vmul.f32 %v3271_v51, %v1718_v50  ;;  %v3233_v50 = vld [vmem:[#allocation22 + $0x188] ss:$16 sps:$4 sm:$0xff]   ;;  %v3236_v51 = vld [vmem:[#allocation22 + $0x160] ss:$16 sps:$4 sm:$0xff]  }
 0x6cb   :  { %v1723_v54 = vmul.f32 %v1721_v52, %v1704_v40  ;;  %v1729_v55 = vrot.slane %v1721_v52, %v3870_v22  ;;  %v3226_v40 = vld [vmem:[#allocation22 + $0x1a4] ss:$16 sps:$4 sm:$0xff]  }
 0x6cc   :  { %v3238_v52 = vld [vmem:[#allocation22 + $0x164] ss:$16 sps:$4 sm:$0xff]  }
 0x6cd   :  { %v1724_v56 = vsub.f32 %v1722_v53, %v1723_v54  ;;  %v1731_v57 = vmul.f32 %v1729_v55, %v1695_v17  ;;  %v1732_v58 = vmul.f32 %v1729_v55, %v1696_v20  ;;  %v3199_v17 = vld [vmem:[#allocation22 + $0x4c] ss:$16 sps:$4 sm:$0xff]   ;;  %v3202_v20 = vld [vmem:[#allocation22 + $0x24] ss:$16 sps:$4 sm:$0xff]   ;;  %v3239_v53 = vld [vmem:[#allocation22 + $0x168] ss:$16 sps:$4 sm:$0xff]  }
 0x6ce   :  { %2435 = vmatprep.subr.bf16.mxu0 %v3202_v20  ;;  %v3241_v54 = vld [vmem:[#allocation22 + $0x16c] ss:$16 sps:$4 sm:$0xff]   ;;  %v3244_v55 = vld [vmem:[#allocation22 + $0x144] ss:$16 sps:$4 sm:$0xff]  }
 0x6cf   :  { %v1737_v59 = vrot.slane %v1724_v56, %v3870_v22  ;;  %2436 = vmatpush1.bf16.msra.mxu0 %v3200_v25  ;;  %v3247_v56 = vld [vmem:[#allocation22 + $0x14c] ss:$16 sps:$4 sm:$0xff]  }
 0x6d0   :  { %2437 = vmatprep.subr.bf16.mxu0 %v3208_v27 }
 0x6d1   :  { %v1740_v60 = vadd.f32 %v1737_v59, %v1732_v58  ;;  %v1739_v61 = vadd.f32 %v1737_v59, %v1731_v57  ;;  %v3242_v57 = vld [vmem:[#allocation22 + $0x140] ss:$16 sps:$4 sm:$0xff]   ;;  %v3245_v58 = vld [vmem:[#allocation22 + $0x148] ss:$16 sps:$4 sm:$0xff]   ;;  %v3250_v59 = vld [vmem:[#allocation22 + $0x124] ss:$16 sps:$4 sm:$0xff]  }
 0x6d3   :  { %v1741_v62 = vpack.c.bf16 %v1740_v60, %v1739_v61  ;;  %2438 = vmatpush1.bf16.msra.mxu0 %v3206_v29  ;;  %v3253_v60 = vld [vmem:[#allocation22 + $0x12c] ss:$16 sps:$4 sm:$0xff]   ;;  %v3248_v61 = vld [vmem:[#allocation22 + $0x120] ss:$16 sps:$4 sm:$0xff]  }
 0x6d4   :  { %2439 = vmatprep.subr.bf16.mxu0 %v3214_v49 }
 0x6d5   :  { %1883 = vmatmul.mubr.bf16.vlgmr.msra.gmra.mxu1 %v1741_v62  ;;  %v3251_v62 = vld [vmem:[#allocation22 + $0x128] ss:$16 sps:$4 sm:$0xff]  }
 0x6d6   :  { %2467 = vmatpush1.bf16.msra.mxu1 %v3167_v2  ;;  %v3257_v2 = vld [vmem:[#allocation22 + $0x108] ss:$16 sps:$4 sm:$0xff]  }
 0x6d7   :  { %2468 = vmatprep.subr.bf16.mxu1 %v3175_v42  ;;  %2440 = vmatpush2.bf16.msra.mxu0 %v3212_v32  ;;  %v1763_v42 = vrot.slane %v1758_v39, %v3870_v22 }
 0x6d8   :  { %2441 = vmatprep.subr.bf16.mxu0 %v3220_v35 }
 0x6da   :  { %2469 = vmatpush1.bf16.msra.mxu1 %v3173_v3 }
 0x6db   :  { %2470 = vmatprep.subr.bf16.mxu1 %v3181_v5  ;;  %2442 = vmatpush2.bf16.msra.mxu0 %v3218_v37 }
 0x6dc   :  { %2443 = vmatprep.subr.bf16.mxu0 %v3226_v40 }
 0x6de   :  { %2471 = vmatpush1.bf16.msra.mxu1 %v3179_v7 }
 0x6df   :  { %2472 = vmatprep.subr.bf16.mxu1 %v3187_v9  ;;  %2444 = vmatpush2.bf16.msra.mxu0 %v3224_v43 }
 0x6e0   :  { %2445 = vmatprep.subr.bf16.mxu0 %v3232_v46 }
 0x6e2   :  { %2473 = vmatpush1.bf16.msra.mxu1 %v3185_v11 }
 0x6e3   :  { %2474 = vmatprep.subr.bf16.mxu1 %v3193_v13  ;;  %2446 = vmatpush2.bf16.msra.mxu0 %v3230_v48 }
 0x6e4   :  { %2447 = vmatprep.subr.bf16.mxu0 %v3238_v52 }
 0x6e6   :  { %2475 = vmatpush1.bf16.msra.mxu1 %v3191_v15 }
 0x6e7   :  { %2476 = vmatprep.subr.bf16.mxu1 %v3199_v17  ;;  %2448 = vmatpush2.bf16.msra.mxu0 %v3236_v51 }
 0x6e8   :  { %2449 = vmatprep.subr.bf16.mxu0 %v3244_v55 }
 0x6ea   :  { %2477 = vmatpush1.bf16.msra.mxu1 %v3197_v19 }
 0x6eb   :  { %2478 = vmatprep.subr.bf16.mxu1 %v3205_v23  ;;  %2450 = vmatpush2.bf16.msra.mxu0 %v3242_v57 }
 0x6ec   :  { %2451 = vmatprep.subr.bf16.mxu0 %v3250_v59 }
 0x6ee   :  { %2479 = vmatpush1.bf16.msra.mxu1 %v3203_v26 }
 0x6ef   :  { %2480 = vmatprep.subr.bf16.mxu1 %v3211_v28  ;;  %2452 = vmatpush2.bf16.msra.mxu0 %v3248_v61 }
 0x6f0   :  { %2453 = vmatprep.subr.bf16.mxu0 %v3256_v63 }
 0x6f2   :  { %2481 = vmatpush1.bf16.msra.mxu1 %v3209_v30 }
 0x6f3   :  { %2482 = vmatprep.subr.bf16.mxu1 %v3217_v31  ;;  %2454 = vmatpush2.bf16.msra.mxu0 %v3254_v1 }
 0x6f6   :  { %2483 = vmatpush2.bf16.msra.mxu1 %v3215_v33 }
 0x6f7   :  { %2484 = vmatprep.subr.bf16.mxu1 %v3223_v36 }
 0x6fa   :  { %2485 = vmatpush2.bf16.msra.mxu1 %v3221_v38 }
 0x6fb   :  { %2486 = vmatprep.subr.bf16.mxu1 %v3229_v41 }
 0x6fe   :  { %2487 = vmatpush2.bf16.msra.mxu1 %v3227_v45 }
 0x6ff   :  { %2488 = vmatprep.subr.bf16.mxu1 %v3235_v47 }
 0x702   :  { %2489 = vmatpush2.bf16.msra.mxu1 %v3233_v50 }
 0x703   :  { %2490 = vmatprep.subr.bf16.mxu1 %v3241_v54 }
 0x706   :  { %2491 = vmatpush2.bf16.msra.mxu1 %v3239_v53 }
 0x707   :  { %2492 = vmatprep.subr.bf16.mxu1 %v3247_v56 }
 0x70a   :  { %2493 = vmatpush2.bf16.msra.mxu1 %v3245_v58 }
 0x70b   :  { %2494 = vmatprep.subr.bf16.mxu1 %v3253_v60 }
 0x70e   :  { %2495 = vmatpush2.bf16.msra.mxu1 %v3251_v62 }
 0x70f   :  { %2496 = vmatprep.subr.bf16.mxu1 %v3259_v0 }
 0x712   :  { %2497 = vmatpush2.bf16.msra.mxu1 %v3257_v2 }
 0x795   :  { %v1884_v3 = vpop.f32.mrf.mxu1 }
 0x796   :  { %v1885_v4 = vadd.f32 %v1884_v3, %v1763_v42  ;;  %v1939_v3 = vld [vmem:[%s4038_s16] sm:$0x3] }
 0x797   :  { %v1886_v5 = vpop.f32.mrf.mxu1 }
 0x798   :  { %v1887_v6 = vadd.f32 %v1886_v5, %v1767_v44  ;;  %v3975_v8 = vmax.f32 %v1885_v4, 0.0 }
 0x799   :  { %v1888_v7 = vpop.f32.mrf.mxu1 }
 0x79a   :  { %v1889_v9 = vadd.f32 %v1888_v7, %v1763_v42  ;;  %v3977_v10 = vmax.f32 %v1887_v6, 0.0  ;;  %v1913_v14 = vmul.f32 %v3975_v8, %v3975_v8 }
 0x79b   :  { %v1890_v11 = vpop.f32.mrf.mxu1 }
 0x79c   :  { %v3979_v12 = vmax.f32 %v1889_v9, 0.0  ;;  %v1891_v13 = vadd.f32 %v1890_v11, %v1767_v44  ;;  %v1914_v18 = vmul.f32 %v3977_v10, %v3977_v10 }
 0x79e   :  { %v1897_v15 = vadd.f32 %v3979_v12, %v3975_v8  ;;  %v1915_v16 = vmul.f32 %v3979_v12, %v3979_v12  ;;  %v1896_v17 = vmax.f32 %v1891_v13, 0.0 }
 0x7a0   :  { %v1898_v19 = vrot.slane %v1897_v15, 4  ;;  %v1917_v20 = vadd.f32 %v1915_v16, %v1913_v14  ;;  %v1904_v23 = vadd.f32 %v1896_v17, %v3977_v10  ;;  %v1916_v25 = vmul.f32 %v1896_v17, %v1896_v17 }
 0x7a2   :  { %v1899_v26 = vadd.f32 %v1898_v19, %v1897_v15  ;;  %v1918_v27 = vrot.slane %v1917_v20, 4  ;;  %v1905_v28 = vrot.slane %v1904_v23, 4  ;;  %v1924_v29 = vadd.f32 %v1916_v25, %v1914_v18  ;;  %v1963_v15 = vld [vmem:[%s4039_s18] sm:$0x3] }
 0x7a4   :  { %v1900_v30 = vrot.slane %v1899_v26, 2  ;;  %v1919_v49 = vadd.f32 %v1918_v27, %v1917_v20  ;;  %v1906_v31 = vadd.f32 %v1905_v28, %v1904_v23  ;;  %v1925_v32 = vrot.slane %v1924_v29, 4 }
 0x7a6   :  { %v1901_v33 = vadd.f32 %v1900_v30, %v1899_v26  ;;  %v1920_v35 = vrot.slane %v1919_v49, 2  ;;  %v1907_v36 = vrot.slane %v1906_v31, 2  ;;  %v1926_v37 = vadd.f32 %v1925_v32, %v1924_v29 }
 0x7a8   :  { %v1902_v38 = vrot.slane %v1901_v33, 1  ;;  %v1921_v40 = vadd.f32 %v1920_v35, %v1919_v49  ;;  %v1908_v41 = vadd.f32 %v1907_v36, %v1906_v31  ;;  %v1927_v43 = vrot.slane %v1926_v37, 2 }
 0x7aa   :  { %v1903_v45 = vadd.f32 %v1902_v38, %v1901_v33  ;;  %v1922_v46 = vrot.slane %v1921_v40, 1  ;;  %v1909_v47 = vrot.slane %v1908_v41, 1  ;;  %v1928_v48 = vadd.f32 %v1927_v43, %v1926_v37 }
 0x7ac   :  { %v1911_v50 = vmul.f32 0.0625, %v1903_v45  ;;  %v1923_v51 = vadd.f32 %v1922_v46, %v1921_v40  ;;  %v1910_v52 = vadd.f32 %v1909_v47, %v1908_v41  ;;  %v1929_v53 = vrot.slane %v1928_v48, 1 }
 0x7ae   :  { %v1931_v54 = vmul.f32 0.0625, %v1923_v51  ;;  %v1933_v55 = vmul.f32 %v1911_v50, %v1911_v50  ;;  %v1912_v56 = vmul.f32 0.0625, %v1910_v52  ;;  %v1930_v57 = vadd.f32 %v1929_v53, %v1928_v48 }
 0x7b0   :  { %v1935_v58 = vsub.f32 %v1931_v54, %v1933_v55  ;;  %v1932_v59 = vmul.f32 0.0625, %v1930_v57  ;;  %v1934_v60 = vmul.f32 %v1912_v56, %v1912_v56 }
 0x7b2   :  { %v1937_v61 = vmax.f32 %v1935_v58, 0.0  ;;  %v1936_v62 = vsub.f32 %v1932_v59, %v1934_v60 }
 0x7b4   :  { %v1940_v63 = vadd.f32 1e-05, %v1937_v61  ;;  %v1938_v0 = vmax.f32 %v1936_v62, 0.0 }
 0x7b6   :  { %v1941_v1 = vadd.f32 1e-05, %v1938_v0  ;;  %3272 = vrsqrt.f32 %v1940_v63 }
 0x7b8   :  { %3274 = vrsqrt.f32 %v1941_v1 }
 0x7c3   :  { %v3273_v2 = vpop.eup %3272 }
 0x7c5   :  { %v3275_v39 = vpop.eup %3274 }
 0x7c6   :  { %v1946_v42 = vcombine.low %v3273_v2, %v3275_v39 }
 0x7c8   :  { %v1953_v44 = vrot.slane %v1946_v42, %v3899_v34 }
 0x7ca   :  { %v1960_v4 = vrot.slane %v1953_v44, %v3899_v34 }
 0x7cc   :  { %v1962_v5 = vmul.f32 %v1960_v4, %v1939_v3 }
 0x7ce   :  { %v1968_v6 = vrot.slane %v1962_v5, %v3870_v22  ;;  %v1972_v7 = vrot.slane %v1962_v5, %v3874_v24 }
 0x7d0   :  { %v1976_v9 = vmul.f32 %v1972_v7, %v1912_v56  ;;  %v1975_v11 = vmul.f32 %v1968_v6, %v1911_v50  ;;  %v1999_v19 = vmul.f32 %v1972_v7, %v1896_v17  ;;  %v1997_v20 = vmul.f32 %v1972_v7, %v3977_v10 }
 0x7d1   :  { %v1996_v25 = vmul.f32 %v1968_v6, %v3975_v8  ;;  %v1998_v26 = vmul.f32 %v1968_v6, %v3979_v12 }
 0x7d2   :  { %v1979_v13 = vcombine.low %v1975_v11, %v1976_v9 }
 0x7d4   :  { %v1986_v14 = vrot.slane %v1979_v13, %v3899_v34 }
 0x7d6   :  { %v1993_v16 = vrot.slane %v1986_v14, %v3899_v34 }
 0x7d8   :  { %v1995_v18 = vsub.f32 %v1963_v15, %v1993_v16 }
 0x7da   :  { %v2008_v23 = vrot.slane %v1995_v18, %v3874_v24  ;;  %v2004_v27 = vrot.slane %v1995_v18, %v3870_v22 }
 0x7dc   :  { %v2012_v28 = vadd.f32 %v2008_v23, %v1997_v20  ;;  %v2014_v29 = vadd.f32 %v2008_v23, %v1999_v19  ;;  %v2011_v30 = vadd.f32 %v2004_v27, %v1996_v25  ;;  %v2013_v49 = vadd.f32 %v2004_v27, %v1998_v26 }
 0x7de   :  { %v2016_v31 = vpack.c.bf16 %v2014_v29, %v2012_v28  ;;  %v2015_v32 = vpack.c.bf16 %v2013_v49, %v2011_v30 }
 0x7e0   :  { %2455 = vmatprep.mubr.bf16.mxu0 %v2016_v31  ;;  %2498 = vmatprep.mubr.bf16.mxu1 %v2016_v31 }
 0x7e1   :  { %2456 = vmatmul.mubr.bf16.vlgmr.msra.gmra.mxu0 %v2015_v32  ;;  %2499 = vmatmul.mubr.bf16.vlgmr.msra.gmra.mxu1 %v2015_v32 }
 0x7e2   :  { %3563 = shalt.err (!%p3560_p13)
}
 0x7e3   :  { %2548 = dma.vmem_to_hbm [thread:$0]  %s2543_s29, 256, %s3825_s12, [#allocation25], %s3641_s0, %s3641_s0, %s3642_s22   ;;  %v2093_v34 = vsub.s32 2, %v3867_v21  ;;  %v2097_v10 = vsub.s32 3, %v3867_v21 }
 0x7e4   :  { %v2081_v8 = vld [vmem:[%s3815_s27] sm:$0xf]  ;;  %s3664_s12 = smov [#allocation23]  }
 0x7e5   :  { %v2086_v12 = vrot.slane %v2081_v8, %v3870_v22  ;;  %v2094_v17 = vrot.slane %v2081_v8, %v2093_v34  ;;  %v2090_v33 = vrot.slane %v2081_v8, %v3874_v24  ;;  %v2098_v35 = vrot.slane %v2081_v8, %v2097_v10  ;;  %s2530_s27 = sshll.u32 %s3664_s12, 4  ;;  %s2531_s27 = int_to_ptr.vmem [resolvable:$true] %s2530_s27 }
 0x7e6   :  { %s3572_s0 = scalar_lea.vmem %s2531_s27, 1024  ;;  %p3577_p1 = scmp.lt.s32.totalorder %s2531_s27, %s2531_s27 }
 0x7e7   :  { %p3573_p0 = scmp.ne.s32.totalorder %s2531_s27, %s3572_s0  ;;  %p3578_p2 = scmp.lt.s32.totalorder %s3572_s0, %s3572_s0 }
 0x7e9   :  { %p3579_p3 = por %p3578_p2, %p3577_p1 }
 0x7eb   :  { %p3580_p4 = pnand %p3579_p3, %p3573_p0 }
 0x8a1   :  { %v2457_v36 = vpop.f32.mrf.mxu0  ;;  %v2500_v37 = vpop.f32.mrf.mxu1 }
 0x8a2   :  { %v2458_v38 = vadd.f32 %v2457_v36, %v2086_v12  ;;  %v2501_v40 = vadd.f32 %v2500_v37, %v2094_v17 }
 0x8a3   :  { %v2459_v41 = vpop.f32.mrf.mxu0  ;;  %v2502_v43 = vpop.f32.mrf.mxu1 }
 0x8a4   :  { %3276 = vtanh.f32 %v2458_v38  ;;  %v2460_v45 = vadd.f32 %v2459_v41, %v2090_v33  ;;  %v2503_v46 = vadd.f32 %v2502_v43, %v2098_v35 }
 0x8a5   :  { %3278 = vtanh.f32 %v2501_v40  ;;  %v2461_v47 = vpop.f32.mrf.mxu0  ;;  %v2504_v48 = vpop.f32.mrf.mxu1 }
 0x8a6   :  { %3280 = vtanh.f32 %v2460_v45  ;;  %v2462_v21 = vadd.f32 %v2461_v47, %v2086_v12  ;;  %v2505_v50 = vadd.f32 %v2504_v48, %v2094_v17 }
 0x8a7   :  { %3282 = vtanh.f32 %v2503_v46  ;;  %v2463_v22 = vpop.f32.mrf.mxu0  ;;  %v2506_v51 = vpop.f32.mrf.mxu1 }
 0x8a8   :  { %3284 = vtanh.f32 %v2462_v21  ;;  %v2464_v24 = vadd.f32 %v2463_v22, %v2090_v33  ;;  %v2507_v52 = vadd.f32 %v2506_v51, %v2098_v35 }
 0x8a9   :  { %3286 = vtanh.f32 %v2505_v50 }
 0x8aa   :  { %3288 = vtanh.f32 %v2464_v24 }
 0x8ab   :  { %3290 = vtanh.f32 %v2507_v52 }
 0x8b1   :  { %v3277_v53 = vpop.eup %3276 }
 0x8b2   :  { %v3279_v54 = vpop.eup %3278  ;;  %2517 = vst [vmem:[#allocation23] sm:$0xff] %v3277_v53 }
 0x8b3   :  { %v3281_v55 = vpop.eup %3280  ;;  %2519 = vst [vmem:[#allocation23 + $0x10] sm:$0xff] %v3279_v54 }
 0x8b4   :  { %v3283_v56 = vpop.eup %3282  ;;  %2518 = vst [vmem:[#allocation23 + $0x8] sm:$0xff] %v3281_v55 }
 0x8b5   :  { %v3285_v57 = vpop.eup %3284  ;;  %2520 = vst [vmem:[#allocation23 + $0x18] sm:$0xff] %v3283_v56 }
 0x8b6   :  { %v3287_v58 = vpop.eup %3286  ;;  %2521 = vst [vmem:[#allocation23 + $0x20] sm:$0xff] %v3285_v57 }
 0x8b7   :  { %v3289_v59 = vpop.eup %3288  ;;  %2523 = vst [vmem:[#allocation23 + $0x30] sm:$0xff] %v3287_v58 }
 0x8b8   :  { %v3291_v60 = vpop.eup %3290  ;;  %2522 = vst [vmem:[#allocation23 + $0x28] sm:$0xff] %v3289_v59 }
 0x8b9   :  { %2524 = vst [vmem:[#allocation23 + $0x38] sm:$0xff] %v3291_v60 }
 0x8ba   :  { %3583 = shalt.err (!%p3580_p4)
}
 0x8bb   :  { %s3665_s22 = smov 512   ;;  %s3666_s28 = smov 32  }
 0x8bc   :  { %2536 = dma.vmem_to_hbm [thread:$0]  %s2531_s27, 1024, %s3820_s4, [#allocation4], %s3665_s22, %s3665_s22, %s3666_s28  }
 0x8bd   :  { %3606 = dma.done.wait [#allocation4], 1024  }
 0x8be   :  { %3607 = vsyncadd [#allocation4], 4294966272 }
 0x8bf   :  { %3608 = dma.done.wait [#allocation25], 256  }
 0x8c0   :  { %3609 = vsyncadd [#allocation25], 4294967040 }
 0x8c1   :  { %2555 = vsyncpa [#allocation3], 1 }
 0x8c2   :  { %2556 = vsyncpa [#allocation6], 1 }
 0x8c3   :  { %2557 = vsyncpa [#allocation9], 1 }
 0x8c4   :  { %2558 = vsyncpa [#allocation12], 1 }
 0x8c5   :  { %2559 = vsyncpa [#allocation15], 1 }
 0x8c6   :  { %2560 = vsyncpa [#allocation18], 1 }
 0x8c7   :  { %2561 = vsyncpa [#allocation21], 1 }
 0x8c8   :  { %2562 = vsyncpa [#allocation4], 1 }
 0x8c9   :  { %2563 = vsyncpa [#allocation25], 1 }

</bundles_post_ra>
